<compile_context>
chip_gen: v7x
topology: tpu7x:2x2x1
jax: 0.10.0
libtpu: 0.0.40
codegen_flags: <defaults>
</compile_context>

<pallas_src>
import jax
import jax.numpy as jnp
import numpy as np
from jax.experimental import pallas as pl
from jax.experimental.pallas import tpu as pltpu

PRELU_ALPHA = 0.25  # PyTorch nn.PReLU() default init (scalar, shared)


def _make_cab_kernel(Bt, H, WC, K):
    P = K // 2
    R = Bt * H  # rows of the packed LHS fed to the MXU

    def cab_kernel(x_ref, a1_ref, a2_ref, d1_ref, d2_ref, o_ref, lhs_ref):
        x3 = x_ref[...]                                  # (Bt, H, WC) f32
        xf = x3.reshape(R, WC)                           # images stacked on rows

        # Per-image row index of every packed row (computed once; sublane iota).
        row_in_img = jax.lax.broadcasted_iota(
            jnp.int32, (Bt, H, WC), 1).reshape(R, WC)

        def fill_lhs(af):
            """Write K row-shifted (zero height-border) copies of af into the
            bf16 LHS scratch at lane offsets dh*WC.  Because images are stacked
            along rows, a single full-height roll differs from the per-image
            shift only at rows that the border mask zeroes anyway."""
            for dh in range(K):
                off = dh - P
                if off == 0:
                    shifted = af
                else:
                    rolled = pltpu.roll(af, shift=(-off) % R, axis=0)  # XLU slot
                    if off < 0:
                        valid = row_in_img >= -off
                    else:
                        valid = row_in_img < H - off
                    shifted = jnp.where(valid, rolled, 0.0)
                lhs_ref[:, dh * WC:(dh + 1) * WC] = shifted.astype(jnp.bfloat16)

        # ---- conv1 (3x3 SAME, no bias): one bf16 MXU matmul + PReLU ---------
        fill_lhs(xf)
        h1 = jnp.dot(lhs_ref[...], a1_ref[...],
                     preferred_element_type=jnp.float32)          # (R, WC) f32
        h1 = jnp.where(h1 > 0, h1, PRELU_ALPHA * h1)

        # ---- conv2 (3x3 SAME, no bias): one bf16 MXU matmul -----------------
        fill_lhs(h1)
        res = jnp.dot(lhs_ref[...], a2_ref[...],
                      preferred_element_type=jnp.float32)         # (R, WC) f32
        res3 = res.reshape(Bt, H, WC)

        # ---- CALayer (per-image GAP -> 1x1 -> ReLU -> 1x1 -> sigmoid) -------
        # Reduce over H per image; d1 folds {mean over W, 1/(H*W), first 1x1};
        # d2 is the block-diagonal second 1x1; the scale comes out tiled over
        # the W*C lanes.  M = Bt for both dots, kept f32 (negligible cost).
        col_sum = jnp.sum(res3, axis=1)                           # (Bt, WC)
        z = jnp.maximum(
            jnp.dot(col_sum, d1_ref[...], preferred_element_type=jnp.float32),
            0.0)
        s = jax.nn.sigmoid(
            jnp.dot(z, d2_ref[...], preferred_element_type=jnp.float32))

        # ---- channel-attention scale + residual add (lane-dense store) ------
        o_ref[...] = (res3 * s[:, None, :] + x3).astype(o_ref.dtype)

    return cab_kernel


def _conv_band_matrix(w_hwio, W):
    """Fold a (K,K,C,C) HWIO SAME-conv into a (K*W*C, W*C) matrix for the
    packed (H, W*C) layout.  Width zero-padding is handled by dropping the
    out-of-range diagonal blocks; height padding is handled in-kernel."""
    K, _, C, _ = w_hwio.shape
    P = K // 2
    blocks = []
    for dh in range(K):
        a = jnp.zeros((W * C, W * C), w_hwio.dtype)
        for dw in range(K):
            a = a + jnp.kron(jnp.eye(W, k=P - dw, dtype=w_hwio.dtype),
                             w_hwio[dh, dw])
        blocks.append(a)
    return jnp.concatenate(blocks, axis=0)               # (K*W*C, W*C)


def _pick_block_batch(B, H, target_rows=128):
    """Images per grid step: aim for >=128 MXU rows (Bt*H) but keep >=2 grid
    steps when possible so both v7x TensorCores get work."""
    bt = min(B, max(1, target_rows // max(H, 1)))
    while B % bt:
        bt -= 1
    if bt == B and B > 1 and B % 2 == 0:
        bt = B // 2
    return bt


def cab_pallas(x, w1, w2, wdu1, wdu2, *, block_batch=None):
    """x: (B, H, W, C) f32; w1/w2: (K, K, C, C) HWIO; wdu1: (C, Cr); wdu2: (Cr, C)."""
    B, H, W, C = x.shape
    K = w1.shape[0]
    Cr = wdu1.shape[1]
    WC = W * C
    if WC % 128 != 0 or H % 8 != 0:
        raise ValueError("packed layout requires W*C % 128 == 0 and H % 8 == 0")
    Bt = _pick_block_batch(B, H) if block_batch is None else block_batch
    if B % Bt != 0:
        raise ValueError("block_batch must divide the batch")
    # TODO(synk): for real MPRNet sizes (n_feat=80, 256x256) the dense band
    # matrix does not scale (~4.7 GB, ~99% zeros): keep weights as KxK (C,C)
    # blocks, do width shifts with pltpu.roll along lanes (shift=+-C), and tile
    # H into row strips with a K-1 halo, budgeting 2x(strip + halo + weights)
    # well under v7x's 64 MiB VMEM (set vmem_limit_bytes accordingly).

    # bf16 conv weights for the MXU (accumulation stays f32 in-kernel).
    a1 = _conv_band_matrix(w1.astype(jnp.float32), W).astype(jnp.bfloat16)
    a2 = _conv_band_matrix(w2.astype(jnp.float32), W).astype(jnp.bfloat16)

    wdu1_pad = jnp.zeros((C, C), jnp.float32).at[:, :Cr].set(wdu1.astype(jnp.float32))
    wdu2_pad = jnp.zeros((C, C), jnp.float32).at[:Cr, :].set(wdu2.astype(jnp.float32))
    # d1: dense over W blocks -> mean over W, the 1/(H*W) normalisation and the
    # first 1x1 conv in one matmul.  d2: block-diagonal second 1x1 conv.
    d1 = jnp.kron(jnp.ones((W, W), jnp.float32), wdu1_pad) / float(H * W)
    d2 = jnp.kron(jnp.eye(W, dtype=jnp.float32), wdu2_pad)

    xp = x.astype(jnp.float32).reshape(B, H, WC)          # lane-dense packing

    # Weight operands have constant index_maps; at this size re-fetching them is
    # <0.5 MiB of VMEM, so we leave the default pipelining.
    # TODO(synk): at production sizes single-buffer a1/a2/d1/d2 (stage once in
    # VMEM scratch or pipeline_mode=pl.Buffered(1)) to reclaim v7x VMEM headroom.
    out = pl.pallas_call(
        _make_cab_kernel(Bt, H, WC, K),
        out_shape=jax.ShapeDtypeStruct((B, H, WC), jnp.float32),
        grid_spec=pltpu.PrefetchScalarGridSpec(
            num_scalar_prefetch=0,
            grid=(B // Bt,),
            in_specs=[
                pl.BlockSpec((Bt, H, WC), lambda b: (b, 0, 0)),
                pl.BlockSpec((K * WC, WC), lambda b: (0, 0)),
                pl.BlockSpec((K * WC, WC), lambda b: (0, 0)),
                pl.BlockSpec((WC, WC), lambda b: (0, 0)),
                pl.BlockSpec((WC, WC), lambda b: (0, 0)),
            ],
            out_specs=pl.BlockSpec((Bt, H, WC), lambda b: (b, 0, 0)),
            scratch_shapes=[pltpu.VMEM((Bt * H, K * WC), jnp.bfloat16)],
        ),
        compiler_params=pltpu.CompilerParams(
            dimension_semantics=("parallel",)),           # batch shards across TCs
    )(xp, a1, a2, d1, d2)
    return out.reshape(B, H, W, C).astype(x.dtype)


def cab_reference(x, w1, w2, wdu1, wdu2):
    """Pure-JAX reference (NHWC), mirrors the PyTorch forward semantics."""
    def conv_same(a, w):
        return jax.lax.conv_general_dilated(
            a, w, window_strides=(1, 1), padding="SAME",
            dimension_numbers=("NHWC", "HWIO", "NHWC"),
            precision=jax.lax.Precision.HIGHEST)

    r = conv_same(x, w1)
    r = jnp.where(r > 0, r, PRELU_ALPHA * r)
    r = conv_same(r, w2)
    y = jnp.mean(r, axis=(1, 2), keepdims=True)                  # (B,1,1,C)
    z = jnp.maximum(jnp.einsum("bijc,cd->bijd", y, wdu1,
                               precision=jax.lax.Precision.HIGHEST), 0.0)
    s = jax.nn.sigmoid(jnp.einsum("bijd,dc->bijc", z, wdu2,
                                  precision=jax.lax.Precision.HIGHEST))
    return r * s + x


if __name__ == "__main__":
    # W*C = 128 lanes; Bt = 8 images per grid step -> Bt*H = 128 MXU rows,
    # grid = (2,) so both v7x TensorCores stay busy.
    B, H, W, C = 16, 16, 16, 8
    K = 3
    reduction = 4
    Cr = C // reduction

    key = jax.random.PRNGKey(0)
    kx, k1, k2, k3, k4 = jax.random.split(key, 5)

    x = jax.random.normal(kx, (B, H, W, C), dtype=jnp.float32)
    # conv weights in HWIO layout (equivalent to PyTorch OIHW up to transpose)
    w1 = 0.1 * jax.random.normal(k1, (K, K, C, C), dtype=jnp.float32)
    w2 = 0.1 * jax.random.normal(k2, (K, K, C, C), dtype=jnp.float32)
    # 1x1 conv weights of the CA layer, stored as (Cin, Cout) matrices
    wdu1 = 0.1 * jax.random.normal(k3, (C, Cr), dtype=jnp.float32)
    wdu2 = 0.1 * jax.random.normal(k4, (Cr, C), dtype=jnp.float32)

    out = jax.block_until_ready(cab_pallas(x, w1, w2, wdu1, wdu2))
    ref = jax.block_until_ready(cab_reference(x, w1, w2, wdu1, wdu2))
    # bf16 MXU operands (f32 accumulation) -> tolerance loosened vs pure f32.
    np.testing.assert_allclose(np.asarray(out), np.asarray(ref),
                               rtol=2e-2, atol=2e-2)

    print("KERNEL_OK")
</pallas_src>

<mosaic_0001>
module attributes {stable_mosaic.version = 11 : i64} {
  func.func @cab_kernel(%arg0: i32, %arg1: memref<8x16x128xf32, #tpu.memory_space<vmem>>, %arg2: memref<384x128xbf16, #tpu.memory_space<vmem>>, %arg3: memref<384x128xbf16, #tpu.memory_space<vmem>>, %arg4: memref<128x128xf32, #tpu.memory_space<vmem>>, %arg5: memref<128x128xf32, #tpu.memory_space<vmem>>, %arg6: memref<8x16x128xf32, #tpu.memory_space<vmem>>, %arg7: memref<128x384xbf16, #tpu.memory_space<vmem>>) attributes {dimension_semantics = [#tpu.dimension_semantics<parallel>], iteration_bounds = array<i64: 2>, scalar_prefetch = 0 : i64, scratch_operands = 1 : i64, tpu.core_type = #tpu.core_type<tc>, window_params = [{transform_indices = @transform_0, window_bounds = array<i64: 8, 16, 128>}, {pipeline_mode = #tpu.pipeline_mode<synchronous>, transform_indices = @transform_1, window_bounds = array<i64: 384, 128>}, {pipeline_mode = #tpu.pipeline_mode<synchronous>, transform_indices = @transform_2, window_bounds = array<i64: 384, 128>}, {pipeline_mode = #tpu.pipeline_mode<synchronous>, transform_indices = @transform_3, window_bounds = array<i64: 128, 128>}, {pipeline_mode = #tpu.pipeline_mode<synchronous>, transform_indices = @transform_4, window_bounds = array<i64: 128, 128>}, {transform_indices = @transform_5, window_bounds = array<i64: 8, 16, 128>}]} {
    %c0 = arith.constant 0 : index
    %c0_0 = arith.constant 0 : index
    %c0_1 = arith.constant 0 : index
    %0 = vector.load %arg1[%c0, %c0_0, %c0_1] : memref<8x16x128xf32, #tpu.memory_space<vmem>>, vector<8x16x128xf32>
    %1 = vector.shape_cast %0 : vector<8x16x128xf32> to vector<128x128xf32>
    %2 = tpu.iota {dimensions = array<i32: 1>} : vector<8x16x128xi32>
    %3 = vector.shape_cast %2 : vector<8x16x128xi32> to vector<128x128xi32>
    %c1_i32 = arith.constant 1 : i32
    %4 = tpu.dynamic_rotate %1 by %c1_i32 dim 0 : vector<128x128xf32>, i32 -> vector<128x128xf32>
    %c1_i32_2 = arith.constant 1 : i32
    %5 = vector.broadcast %c1_i32_2 : i32 to vector<128x128xi32>
    %6 = arith.cmpi sge, %3, %5 : vector<128x128xi32>
    %cst = arith.constant 0.000000e+00 : f32
    %7 = vector.broadcast %cst : f32 to vector<128x128xf32>
    %8 = arith.select %6, %4, %7 : vector<128x128xi1>, vector<128x128xf32>
    %9 = arith.truncf %8 : vector<128x128xf32> to vector<128x128xbf16>
    %c0_3 = arith.constant 0 : index
    %c0_4 = arith.constant 0 : index
    %10 = vector.load %arg7[%c0_3, %c0_4] : memref<128x384xbf16, #tpu.memory_space<vmem>>, vector<128x128xbf16>
    tpu.vector_store %arg7[%c0_3, %c0_4], %9 {strides = array<i32>} : memref<128x384xbf16, #tpu.memory_space<vmem>>, vector<128x128xbf16>,
    %11 = arith.truncf %1 : vector<128x128xf32> to vector<128x128xbf16>
    %c0_5 = arith.constant 0 : index
    %c128 = arith.constant 128 : index
    %12 = vector.load %arg7[%c0_5, %c128] : memref<128x384xbf16, #tpu.memory_space<vmem>>, vector<128x128xbf16>
    tpu.vector_store %arg7[%c0_5, %c128], %11 {strides = array<i32>} : memref<128x384xbf16, #tpu.memory_space<vmem>>, vector<128x128xbf16>,
    %c127_i32 = arith.constant 127 : i32
    %13 = tpu.dynamic_rotate %1 by %c127_i32 dim 0 : vector<128x128xf32>, i32 -> vector<128x128xf32>
    %c15_i32 = arith.constant 15 : i32
    %14 = vector.broadcast %c15_i32 : i32 to vector<128x128xi32>
    %15 = arith.cmpi slt, %3, %14 : vector<128x128xi32>
    %cst_6 = arith.constant 0.000000e+00 : f32
    %16 = vector.broadcast %cst_6 : f32 to vector<128x128xf32>
    %17 = arith.select %15, %13, %16 : vector<128x128xi1>, vector<128x128xf32>
    %18 = arith.truncf %17 : vector<128x128xf32> to vector<128x128xbf16>
    %c0_7 = arith.constant 0 : index
    %c256 = arith.constant 256 : index
    %19 = vector.load %arg7[%c0_7, %c256] : memref<128x384xbf16, #tpu.memory_space<vmem>>, vector<128x128xbf16>
    tpu.vector_store %arg7[%c0_7, %c256], %18 {strides = array<i32>} : memref<128x384xbf16, #tpu.memory_space<vmem>>, vector<128x128xbf16>,
    %c0_8 = arith.constant 0 : index
    %c0_9 = arith.constant 0 : index
    %20 = vector.load %arg7[%c0_8, %c0_9] : memref<128x384xbf16, #tpu.memory_space<vmem>>, vector<128x384xbf16>
    %c0_10 = arith.constant 0 : index
    %c0_11 = arith.constant 0 : index
    %21 = vector.load %arg2[%c0_10, %c0_11] : memref<384x128xbf16, #tpu.memory_space<vmem>>, vector<384x128xbf16>
    %cst_12 = arith.constant dense<0.000000e+00> : vector<128x128xf32>
    %22 = tpu.matmul %20, %21, %cst_12 {dimension_numbers = #tpu.dot_dimension_numbers<[1], [0], [0], [1], [0, 0, 1, 1], [], []>} : vector<128x384xbf16>, vector<384x128xbf16>, vector<128x128xf32> -> vector<128x128xf32>
    %cst_13 = arith.constant 0.000000e+00 : f32
    %23 = vector.broadcast %cst_13 : f32 to vector<128x128xf32>
    %24 = arith.cmpf ogt, %22, %23 : vector<128x128xf32>
    %cst_14 = arith.constant 2.500000e-01 : f32
    %25 = vector.broadcast %cst_14 : f32 to vector<128x128xf32>
    %26 = arith.mulf %25, %22 : vector<128x128xf32>
    %27 = arith.select %24, %22, %26 : vector<128x128xi1>, vector<128x128xf32>
    %c1_i32_15 = arith.constant 1 : i32
    %28 = tpu.dynamic_rotate %27 by %c1_i32_15 dim 0 : vector<128x128xf32>, i32 -> vector<128x128xf32>
    %c1_i32_16 = arith.constant 1 : i32
    %29 = vector.broadcast %c1_i32_16 : i32 to vector<128x128xi32>
    %30 = arith.cmpi sge, %3, %29 : vector<128x128xi32>
    %cst_17 = arith.constant 0.000000e+00 : f32
    %31 = vector.broadcast %cst_17 : f32 to vector<128x128xf32>
    %32 = arith.select %30, %28, %31 : vector<128x128xi1>, vector<128x128xf32>
    %33 = arith.truncf %32 : vector<128x128xf32> to vector<128x128xbf16>
    %c0_18 = arith.constant 0 : index
    %c0_19 = arith.constant 0 : index
    %34 = vector.load %arg7[%c0_18, %c0_19] : memref<128x384xbf16, #tpu.memory_space<vmem>>, vector<128x128xbf16>
    tpu.vector_store %arg7[%c0_18, %c0_19], %33 {strides = array<i32>} : memref<128x384xbf16, #tpu.memory_space<vmem>>, vector<128x128xbf16>,
    %35 = arith.truncf %27 : vector<128x128xf32> to vector<128x128xbf16>
    %c0_20 = arith.constant 0 : index
    %c128_21 = arith.constant 128 : index
    %36 = vector.load %arg7[%c0_20, %c128_21] : memref<128x384xbf16, #tpu.memory_space<vmem>>, vector<128x128xbf16>
    tpu.vector_store %arg7[%c0_20, %c128_21], %35 {strides = array<i32>} : memref<128x384xbf16, #tpu.memory_space<vmem>>, vector<128x128xbf16>,
    %c127_i32_22 = arith.constant 127 : i32
    %37 = tpu.dynamic_rotate %27 by %c127_i32_22 dim 0 : vector<128x128xf32>, i32 -> vector<128x128xf32>
    %c15_i32_23 = arith.constant 15 : i32
    %38 = vector.broadcast %c15_i32_23 : i32 to vector<128x128xi32>
    %39 = arith.cmpi slt, %3, %38 : vector<128x128xi32>
    %cst_24 = arith.constant 0.000000e+00 : f32
    %40 = vector.broadcast %cst_24 : f32 to vector<128x128xf32>
    %41 = arith.select %39, %37, %40 : vector<128x128xi1>, vector<128x128xf32>
    %42 = arith.truncf %41 : vector<128x128xf32> to vector<128x128xbf16>
    %c0_25 = arith.constant 0 : index
    %c256_26 = arith.constant 256 : index
    %43 = vector.load %arg7[%c0_25, %c256_26] : memref<128x384xbf16, #tpu.memory_space<vmem>>, vector<128x128xbf16>
    tpu.vector_store %arg7[%c0_25, %c256_26], %42 {strides = array<i32>} : memref<128x384xbf16, #tpu.memory_space<vmem>>, vector<128x128xbf16>,
    %c0_27 = arith.constant 0 : index
    %c0_28 = arith.constant 0 : index
    %44 = vector.load %arg7[%c0_27, %c0_28] : memref<128x384xbf16, #tpu.memory_space<vmem>>, vector<128x384xbf16>
    %c0_29 = arith.constant 0 : index
    %c0_30 = arith.constant 0 : index
    %45 = vector.load %arg3[%c0_29, %c0_30] : memref<384x128xbf16, #tpu.memory_space<vmem>>, vector<384x128xbf16>
    %cst_31 = arith.constant dense<0.000000e+00> : vector<128x128xf32>
    %46 = tpu.matmul %44, %45, %cst_31 {dimension_numbers = #tpu.dot_dimension_numbers<[1], [0], [0], [1], [0, 0, 1, 1], [], []>} : vector<128x384xbf16>, vector<384x128xbf16>, vector<128x128xf32> -> vector<128x128xf32>
    %47 = vector.shape_cast %46 : vector<128x128xf32> to vector<8x16x128xf32>
    %cst_32 = arith.constant dense<0.000000e+00> : vector<8x128xf32>
    %48 = vector.multi_reduction <add>, %47, %cst_32 [1] : vector<8x16x128xf32> to vector<8x128xf32>
    %c0_33 = arith.constant 0 : index
    %c0_34 = arith.constant 0 : index
    %49 = vector.load %arg4[%c0_33, %c0_34] : memref<128x128xf32, #tpu.memory_space<vmem>>, vector<128x128xf32>
    %cst_35 = arith.constant dense<0.000000e+00> : vector<8x128xf32>
    %50 = tpu.matmul %48, %49, %cst_35 {dimension_numbers = #tpu.dot_dimension_numbers<[1], [0], [0], [1], [0, 0, 1, 1], [], []>} : vector<8x128xf32>, vector<128x128xf32>, vector<8x128xf32> -> vector<8x128xf32>
    %cst_36 = arith.constant 0.000000e+00 : f32
    %51 = vector.broadcast %cst_36 : f32 to vector<8x128xf32>
    %52 = arith.maximumf %50, %51 : vector<8x128xf32>
    %c0_37 = arith.constant 0 : index
    %c0_38 = arith.constant 0 : index
    %53 = vector.load %arg5[%c0_37, %c0_38] : memref<128x128xf32, #tpu.memory_space<vmem>>, vector<128x128xf32>
    %cst_39 = arith.constant dense<0.000000e+00> : vector<8x128xf32>
    %54 = tpu.matmul %52, %53, %cst_39 {dimension_numbers = #tpu.dot_dimension_numbers<[1], [0], [0], [1], [0, 0, 1, 1], [], []>} : vector<8x128xf32>, vector<128x128xf32>, vector<8x128xf32> -> vector<8x128xf32>
    %55 = arith.negf %54 : vector<8x128xf32>
    %56 = math.exp %55 : vector<8x128xf32>
    %cst_40 = arith.constant 1.000000e+00 : f32
    %57 = vector.broadcast %cst_40 : f32 to vector<8x128xf32>
    %58 = arith.addf %57, %56 : vector<8x128xf32>
    %59 = arith.divf %57, %58 : vector<8x128xf32>
    %60 = vector.shape_cast %59 : vector<8x128xf32> to vector<8x1x128xf32>
    %61 = vector.broadcast %60 : vector<8x1x128xf32> to vector<8x16x128xf32>
    %62 = arith.mulf %47, %61 : vector<8x16x128xf32>
    %63 = arith.addf %62, %0 : vector<8x16x128xf32>
    %c0_41 = arith.constant 0 : index
    %c0_42 = arith.constant 0 : index
    %c0_43 = arith.constant 0 : index
    %64 = vector.load %arg6[%c0_41, %c0_42, %c0_43] : memref<8x16x128xf32, #tpu.memory_space<vmem>>, vector<8x16x128xf32>
    tpu.vector_store %arg6[%c0_41, %c0_42, %c0_43], %63 {strides = array<i32>} : memref<8x16x128xf32, #tpu.memory_space<vmem>>, vector<8x16x128xf32>,
    return
  }
  func.func @transform_0(%arg0: i32) -> (i32, i32, i32) {
    %c0_i32 = arith.constant 0 : i32
    %c0_i32_0 = arith.constant 0 : i32
    %c0_i32_1 = arith.constant 0 : i32
    return %arg0, %c0_i32, %c0_i32_0 : i32, i32, i32
  }
  func.func @transform_1(%arg0: i32) -> (i32, i32) {
    %c0_i32 = arith.constant 0 : i32
    %c0_i32_0 = arith.constant 0 : i32
    %c0_i32_1 = arith.constant 0 : i32
    return %c0_i32, %c0_i32_0 : i32, i32
  }
  func.func @transform_2(%arg0: i32) -> (i32, i32) {
    %c0_i32 = arith.constant 0 : i32
    %c0_i32_0 = arith.constant 0 : i32
    %c0_i32_1 = arith.constant 0 : i32
    return %c0_i32, %c0_i32_0 : i32, i32
  }
  func.func @transform_3(%arg0: i32) -> (i32, i32) {
    %c0_i32 = arith.constant 0 : i32
    %c0_i32_0 = arith.constant 0 : i32
    %c0_i32_1 = arith.constant 0 : i32
    return %c0_i32, %c0_i32_0 : i32, i32
  }
  func.func @transform_4(%arg0: i32) -> (i32, i32) {
    %c0_i32 = arith.constant 0 : i32
    %c0_i32_0 = arith.constant 0 : i32
    %c0_i32_1 = arith.constant 0 : i32
    return %c0_i32, %c0_i32_0 : i32, i32
  }
  func.func @transform_5(%arg0: i32) -> (i32, i32, i32) {
    %c0_i32 = arith.constant 0 : i32
    %c0_i32_0 = arith.constant 0 : i32
    %c0_i32_1 = arith.constant 0 : i32
    return %arg0, %c0_i32, %c0_i32_0 : i32, i32, i32
  }
}

</mosaic_0001>

<bundles_post_ra>
// kernel: tpu_custom_call.1
= control target key start
LH: loop header
LB: loop body
LE: loop exit
PB: predicated region body
PF: predicated region fallthrough
CT: control target
= control target key end

     0   :  { %10 = vsyncpa [#allocation4], 0  ;;  %s3878_s0 = inlined_call_operand.hbm [shape: f32[16,16,128], index: 0, kind: input, shape index: {}]   ;;  %s3879_s1 = inlined_call_operand.hbm [shape: bf16[384,128], index: 1, kind: input, shape index: {}]   ;;  %s3880_s2 = inlined_call_operand.hbm [shape: bf16[384,128], index: 2, kind: input, shape index: {}]   ;;  %s3881_s3 = inlined_call_operand.hbm [shape: f32[128,128], index: 3, kind: input, shape index: {}]   ;;  %s3882_s4 = inlined_call_operand.hbm [shape: f32[128,128], index: 4, kind: input, shape index: {}]   ;;  %s3883_s5 = inlined_call_operand.hbm [shape: f32[16,16,128], index: 5, kind: output, shape index: {}]  }
   0x1   :  { %12 = vsyncpa [#allocation4 + $0x1], 0 }
   0x2   :  { %13 = vsyncpa [#allocation7], 0 }
   0x3   :  { %14 = vsyncpa [#allocation10], 0 }
   0x4   :  { %15 = vsyncpa [#allocation5], 0 }
   0x5   :  { %17 = vsyncpa [#allocation5 + $0x1], 0  ;;  %s2988_s18 = smov 0   ;;  %s2990_s19 = smov 0  }
   0x6   :  { %s2992_s20 = smov 0   ;;  %s2994_s21 = smov 0  }
   0x7 LB: > { %s3009_s22 = sadd.s32 4294967295, %s2939_s21   ;;  %s2008_s23 = sadd.s32 4294967294, %s2939_s21   ;;  %s2939_s21 = sphi %s2994_s21, %s3912_s21   ;;  %s2935_s20 = sphi %s2992_s20, %s3911_s20   ;;  %s2931_s19 = sphi %s2990_s19, %s3910_s19   ;;  %s2927_s18 = sphi %s2988_s18, %s3909_s18  }
   0x8   : > { %p43_p0 = scmp.ne.s32.totalorder %s2931_s19, %s2927_s18  ;;  %p3884_p1 = scmp.eq.s32.totalorder %s3009_s22, 0 }
   0x9   : > { %p157_p3 = scmp.eq.s32.totalorder %s2008_s23, 1  ;;  %p2009_p5 = scmp.ge.s32.totalorder %s2939_s21, 1 }
   0xa   : > { %p3018_p4 = por %p3884_p1, %p43_p0  ;;  %p164_p7 = scmp.lt.s32.totalorder %s2939_s21, 3 }
   0xb   : > { %p3023_p6 = por %p157_p3, %p43_p0  ;;  %s2941_s27 = smov [#allocation6]  }
   0xc   : > { %s3888_s24 = scalar_select %p3018_p4, 1, 0 }
   0xd   : > { %s3889_s25 = scalar_select %p3023_p6, 1, 0 }
   0xe   : > { %p3028_p8 = pnand %p2009_p5, %p164_p7  ;;  %s176_s28 = sshll.u32 %s2941_s27, 4  ;;  %s3032_s28 = int_to_ptr.vmem [resolvable:$true] %s176_s28 }
   0xf   : > { %s2942_s30 = smov [#allocation9]   ;;  %s2723_s9 = scalar_lea.hbm %s3879_s1, 3072 }
  0x10   : > { %s3890_s26 = scalar_select %p3028_p8, 1, 0 }
  0x11   : > { %p2577_p9 = pneg %p3028_p8  ;;  %s202_s6 = sshll.u32 %s2942_s30, 4  ;;  %s3043_s6 = int_to_ptr.vmem [resolvable:$true] %s202_s6 }
  0x12   : > { %p2724_p12 = scmp.ne.s32.totalorder %s3879_s1, %s2723_s9  ;;  %p2730_p5 = scmp.lt.u32.totalorder %s2723_s9, %s3879_s1 }
  0x13   : > { %p3039_p11 = pnand %p2577_p9, %p3884_p1 }
  0x15   : > { %p3053_p13 = pneg %p3039_p11 }
  0x17   : > { %p2726_p0 = pnand %p3053_p13, %p2724_p12 }
  0x19   : > { %p2727_p3 = pneg %p2726_p0 }
  0x1b   : > { %p2732_p7 = pnand %p2730_p5, %p2727_p3 }
  0x1d   : > { %2735 = shalt.err (!%p2732_p7)
}
  0x1e   : > { %s2736_s15 = scalar_lea.vmem %s3032_s28, 3072  ;;  %p2744_p2 = scmp.lt.s32.totalorder %s3032_s28, %s3032_s28 }
  0x1f   : > { %p2737_p9 = scmp.ne.s32.totalorder %s3032_s28, %s2736_s15  ;;  %p2745_p6 = scmp.lt.s32.totalorder %s2736_s15, %s2736_s15 }
  0x21   : > { %p2739_p10 = pnand %p2737_p9, %p3053_p13  ;;  %p2746_p12 = por %p2745_p6, %p2744_p2 }
  0x23   : > { %p2740_p1 = pneg %p2739_p10 }
  0x25   : > { %p2747_p0 = pnand %p2746_p12, %p2740_p1 }
  0x27   : > { %2750 = shalt.err (!%p2747_p0)
}
  0x28   : > { %s3885_s16 = smov 64   ;;  %s2944_s17 = smov 4  }
  0x29   : > { %2580 = dma.hbm_to_vmem [thread:$0]  (!%p3039_p11), %s3879_s1, 3072, %s3032_s28, [#allocation7], %s3885_s16, %s3885_s16, %s2944_s17  }
  0x2a   : > { %s2751_s8 = scalar_lea.hbm %s3881_s3, 2048 }
  0x2b   : > { %p2752_p1 = scmp.ne.s32.totalorder %s3881_s3, %s2751_s8  ;;  %p2758_p10 = scmp.lt.u32.totalorder %s2751_s8, %s3881_s3 }
  0x2d   : > { %p2754_p2 = pnand %p2752_p1, %p3053_p13 }
  0x2f   : > { %p2755_p6 = pneg %p2754_p2 }
  0x31   : > { %p2760_p3 = pnand %p2758_p10, %p2755_p6 }
  0x33   : > { %2763 = shalt.err (!%p2760_p3)
}
  0x34   : > { %s2764_s28 = scalar_lea.vmem %s3043_s6, 2048  ;;  %p2772_p12 = scmp.lt.s32.totalorder %s3043_s6, %s3043_s6 }
  0x35   : > { %p2765_p5 = scmp.ne.s32.totalorder %s3043_s6, %s2764_s28  ;;  %p2773_p0 = scmp.lt.s32.totalorder %s2764_s28, %s2764_s28 }
  0x37   : > { %p2767_p7 = pnand %p2765_p5, %p3053_p13  ;;  %p2774_p1 = por %p2773_p0, %p2772_p12 }
  0x39   : > { %p2768_p9 = pneg %p2767_p7 }
  0x3b   : > { %p2775_p2 = pnand %p2774_p1, %p2768_p9 }
  0x3d   : > { %2778 = shalt.err (!%p2775_p2)
}
  0x3e   : > { %s2945_s14 = smov 128   ;;  %s2946_s15 = smov 8  }
  0x3f   : > { %2586 = dma.hbm_to_vmem [thread:$0]  (!%p3039_p11), %s3881_s3, 2048, %s3043_s6, [#allocation10], %s2945_s14, %s2945_s14, %s2946_s15  }
  0x40   : > { %s2947_s30 = smov [#allocation8]   ;;  %s2948_s8 = smov [#allocation11]  }
  0x41   : > { %s189_s7 = sshll.u32 %s2947_s30, 4  ;;  %s215_s9 = sshll.u32 %s2948_s8, 4  ;;  %s190_s7 = int_to_ptr.vmem [resolvable:$true] %s189_s7  ;;  %s3103_s9 = int_to_ptr.vmem [resolvable:$true] %s215_s9 }
  0x42   : > { %s2779_s13 = scalar_lea.hbm %s3880_s2, 3072 }
  0x43   : > { %p2780_p6 = scmp.ne.s32.totalorder %s3880_s2, %s2779_s13  ;;  %p2786_p5 = scmp.lt.u32.totalorder %s2779_s13, %s3880_s2 }
  0x45   : > { %p2782_p10 = pnand %p2780_p6, %p3053_p13 }
  0x47   : > { %p2783_p3 = pneg %p2782_p10 }
  0x49   : > { %p2788_p7 = pnand %p2786_p5, %p2783_p3 }
  0x4b   : > { %2791 = shalt.err (!%p2788_p7)
}
  0x4c   : > { %s2792_s27 = scalar_lea.vmem %s190_s7, 3072  ;;  %p2800_p1 = scmp.lt.s32.totalorder %s190_s7, %s190_s7 }
  0x4d   : > { %p2793_p9 = scmp.ne.s32.totalorder %s190_s7, %s2792_s27  ;;  %p2801_p2 = scmp.lt.s32.totalorder %s2792_s27, %s2792_s27 }
  0x4f   : > { %p2795_p12 = pnand %p2793_p9, %p3053_p13  ;;  %p2802_p4 = por %p2801_p2, %p2800_p1 }
  0x51   : > { %p2796_p0 = pneg %p2795_p12 }
  0x53   : > { %p2803_p8 = pnand %p2802_p4, %p2796_p0 }
  0x55   : > { %2806 = shalt.err (!%p2803_p8)
}
  0x56   : > { %s3893_s16 = smov 64   ;;  %s2807_s13 = scalar_lea.hbm %s3882_s4, 2048 }
  0x57   : > { %2583 = dma.hbm_to_vmem [thread:$0]  (!%p3039_p11), %s3880_s2, 3072, %s190_s7, [#allocation7], %s3893_s16, %s3893_s16, %s2944_s17  }
  0x58   : > { %p2808_p6 = scmp.ne.s32.totalorder %s3882_s4, %s2807_s13  ;;  %p2814_p10 = scmp.lt.u32.totalorder %s2807_s13, %s3882_s4 }
  0x5a   : > { %p2810_p4 = pnand %p2808_p6, %p3053_p13 }
  0x5c   : > { %p2811_p8 = pneg %p2810_p4 }
  0x5e   : > { %p2816_p3 = pnand %p2814_p10, %p2811_p8 }
  0x60   : > { %2819 = shalt.err (!%p2816_p3)
}
  0x61   : > { %s2820_s17 = scalar_lea.vmem %s3103_s9, 2048  ;;  %p2828_p12 = scmp.lt.s32.totalorder %s3103_s9, %s3103_s9 }
  0x62   : > { %p2821_p5 = scmp.ne.s32.totalorder %s3103_s9, %s2820_s17  ;;  %p2829_p0 = scmp.lt.s32.totalorder %s2820_s17, %s2820_s17 }
  0x64   : > { %p2823_p7 = pnand %p2821_p5, %p3053_p13  ;;  %p2830_p1 = por %p2829_p0, %p2828_p12 }
  0x66   : > { %p2824_p9 = pneg %p2823_p7 }
  0x68   : > { %p2831_p2 = pnand %p2830_p1, %p2824_p9 }
  0x6a   : > { %2834 = shalt.err (!%p2831_p2)
}
  0x6b   : > { %2589 = dma.hbm_to_vmem [thread:$0]  (!%p3039_p11), %s3882_s4, 2048, %s3103_s9, [#allocation10], %s2945_s14, %s2945_s14, %s2946_s15  }
  0x6c   : > { %s3153_s29 = sadd.s32 1, %s2939_s21   ;;  %s30_s30 = sadd.s32 1, %s2935_s20 }
  0x6d   : > { %s27_s12 = ssub.s32 %s2939_s21, %s3153_s29  ;;  %p37_p6 = scmp.ne.s32.totalorder %s2935_s20, %s2931_s19 }
  0x6e   : > { %p28_p13 = scmp.eq.s32.totalorder %s27_s12, 0  ;;  %p38_p4 = scmp.eq.s32.totalorder %s2939_s21, 0 }
  0x6f   : > { %p3894_p10 = scmp.eq.s32.totalorder %s3009_s22, 1  ;;  %p2602_p5 = scmp.lt.s32.totalorder %s2939_s21, 2 }
  0x70   : > { %s3162_s8 = scalar_select %p28_p13, %s2935_s20, %s30_s30  }
  0x71   : > { %p39_p8 = por %p38_p4, %p37_p6  ;;  %p3166_p3 = por %p3894_p10, %p37_p6 }
  0x72   : > { %s229_s11 = sand.u32 1, %s2935_s20   ;;  %s2082_s9 = sshll.u32 %s2939_s21, 11 }
  0x73   : > { %s2015_s13 = sshll.u32 %s229_s11, 7  ;;  %s3176_s6 = scalar_lea.hbm %s3878_s0, %s2082_s9 }
  0x74   : > { %s233_s27 = scalar_lea.vmem [#allocation3], %s2015_s13  ;;  %p3180_p11 = pnand %p2602_p5, %p39_p8 }
  0x75   : > { %s241_s17 = sshll.u32 %s233_s27, 4  ;;  %s3184_s16 = scalar_lea.sflag [#allocation4], %s229_s11  ;;  %s3178_s17 = int_to_ptr.vmem [resolvable:$true] %s241_s17 }
  0x76   : > { %s2835_s12 = scalar_lea.hbm %s3176_s6, 2048  ;;  %p2837_p9 = pneg %p3180_p11 }
  0x77   : > { %p2836_p7 = scmp.ne.s32.totalorder %s3176_s6, %s2835_s12  ;;  %s2840_s9 = scalar_lea.hbm %s3878_s0, 4096 }
  0x78   : > { %p2841_p1 = scmp.lt.u32.totalorder %s3176_s6, %s3878_s0  ;;  %p2842_p2 = scmp.lt.u32.totalorder %s2840_s9, %s2835_s12 }
  0x79   : > { %p2838_p12 = pnand %p2837_p9, %p2836_p7  ;;  %p2844_p6 = scmp.lt.u32.totalorder %s2835_s12, %s3176_s6 }
  0x7a   : > { %p2843_p13 = por %p2842_p2, %p2841_p1 }
  0x7b   : > { %p2839_p0 = pneg %p2838_p12 }
  0x7c   : > { %p2845_p4 = por %p2844_p6, %p2843_p13 }
  0x7e   : > { %p2846_p8 = pnand %p2845_p4, %p2839_p0 }
  0x80   : > { %2849 = shalt.err (!%p2846_p8)
}
  0x81   : > { %s2850_s11 = scalar_lea.vmem %s3178_s17, 2048  ;;  %s2949_s27 = smov [#allocation3]  }
  0x82   : > { %p2851_p10 = scmp.ne.s32.totalorder %s3178_s17, %s2850_s11  ;;  %s2855_s30 = sshll.u32 %s2949_s27, 4  ;;  %s2856_s30 = int_to_ptr.vmem [resolvable:$false] %s2855_s30 }
  0x83   : > { %s2857_s13 = scalar_lea.vmem %s2856_s30, 4096  ;;  %p2858_p12 = scmp.lt.s32.totalorder %s3178_s17, %s2856_s30 }
  0x84   : > { %p2853_p5 = pnand %p2851_p10, %p2837_p9  ;;  %p2859_p1 = scmp.lt.s32.totalorder %s2857_s13, %s2850_s11 }
  0x86   : > { %p2854_p7 = pneg %p2853_p5  ;;  %p2860_p2 = por %p2859_p1, %p2858_p12 }
  0x88   : > { %p2861_p13 = pnand %p2860_p2, %p2854_p7 }
  0x8a   : > { %2864 = shalt.err (!%p2861_p13)
}
  0x8b   : > { %2593 = dma.hbm_to_vmem [thread:$0]  (!%p3180_p11), %s3176_s6, 2048, %s3178_s17, %s3184_s16, %s2945_s14, %s2945_s14, %s2946_s15  }
  0x8c   : > { %p3897_p9 = scmp.ne.s32.totalorder %s3890_s26, 0 }
  0x8d   : > { %s3218_s12 = sand.u32 (!%p3897_p9), 1, %s2931_s19   ;;  %p3898_p0 = scmp.ne.s32.totalorder (!%p3897_p9), %s3888_s24, 0 }
  0x8e   : > { %253 = sbr.rel (%p3897_p9) target bundleno = 1252 (0x4e4), region = 40  ;;  %s2020_s9 = sshll.u32 (!%p3897_p9), %s3218_s12, 7 }
  0x8f   : > { %s256_s28 = scalar_lea.sflag (!%p3897_p9), [#allocation4], %s3218_s12  ;;  %s3224_s7 = scalar_lea.vmem (!%p3897_p9), [#allocation3], %s2020_s9 }
  0x95   : > { %2910 = dma.done.wait (%p3898_p0), %s256_s28, 2048  }
  0x96   : > { %2912 = vsyncadd (%p3898_p0), %s256_s28, 4294965248  ;;  %p3899_p11 = scmp.eq.s32.totalorder %s3009_s22, 0 }
  0x98   : > { %2914 = dma.done.wait (%p3899_p11), [#allocation7], 6144   ;;  %p3900_p6 = pmov %p3899_p11 }
  0x9a   : > { %2916 = vsyncadd (%p3900_p6), [#allocation7], 4294961152  ;;  %p3901_p4 = pmov %p3900_p6 }
  0x9c   : > { %2918 = dma.done.wait (%p3901_p4), [#allocation10], 4096   ;;  %p3902_p8 = pmov %p3901_p4 }
  0x9d   : > { %v2655_v0 = vld [vmem:[#allocation6 + $0x40] sm:$0xff]   ;;  %v2658_v3 = vld [vmem:[#allocation6 + $0x48] sm:$0xff]   ;;  %v2661_v6 = vld [vmem:[#allocation6 + $0x50] sm:$0xff]   ;;  %v321_v13 = vlaneseq  ;;  %vm2950_vm4 = vmmov 1   ;;  %s2084_s24 = sshll.u32 %s3009_s22, 11  ;;  %s3791_s26 = scalar_lea.vmem [#allocation12], %s2020_s9 }
  0x9e   : > { %2920 = vsyncadd (%p3902_p8), [#allocation10], 4294963200  ;;  %v2656_v1 = vld [vmem:[#allocation6] sm:$0xff]   ;;  %2181 = vmatprep.subr.bf16.mxu0 %v2655_v0  ;;  %v2659_v4 = vld [vmem:[#allocation6 + $0x8] sm:$0xff]   ;;  %s1897_s14 = sshll.u32 %s3791_s26, 4  ;;  %s3816_s17 = scalar_lea.hbm %s3883_s5, %s2084_s24  ;;  %s3820_s14 = int_to_ptr.vmem [resolvable:$true] %s1897_s14 }
  0x9f   : > { %v2657_v2 = vld [vmem:[#allocation6 + $0x80] sm:$0xff]   ;;  %2182 = vmatpush3.bf16.msra.mxu0 %v2656_v1  ;;  %v2660_v5 = vld [vmem:[#allocation6 + $0x88] sm:$0xff]   ;;  %v2662_v7 = vld [vmem:[#allocation6 + $0x10] sm:$0xff]   ;;  %v3238_v17 = vshrl.u32 %v321_v13, 7  ;;  %s1883_s22 = scalar_lea.sflag [#allocation5], %s3218_s12  ;;  %s2865_s16 = scalar_lea.vmem %s3820_s14, 2048 }
  0xa0   : > { %2375 = vmatprep.subr.bf16.mxu1 %v2657_v2  ;;  %2183 = vmatprep.subr.bf16.mxu0 %v2658_v3  ;;  %v2663_v8 = vld [vmem:[#allocation6 + $0x90] sm:$0xff]   ;;  %v2664_v9 = vld [vmem:[#allocation6 + $0x58] sm:$0xff]   ;;  %v2667_v12 = vld [vmem:[#allocation6 + $0x60] sm:$0xff]   ;;  %p2866_p10 = scmp.ne.s32.totalorder %s3820_s14, %s2865_s16  ;;  %s2955_s23 = smov [#allocation12]  }
  0xa1   : > { %2376 = vmatpush3.bf16.msra.mxu1 %v2657_v2  ;;  %v2665_v10 = vld [vmem:[#allocation6 + $0x18] sm:$0xff]   ;;  %v2669_v14 = vld [vmem:[#allocation6 + $0xa0] sm:$0xff]   ;;  %v2670_v16 = vld [vmem:[#allocation6 + $0x68] sm:$0xff]   ;;  %v323_v21 = vadd.s32 8, %v3238_v17  ;;  %vm340_vm0 = vcmp.lt.s32.totalorder %v3238_v17, 1  ;;  %vm423_vm1 = vcmp.lt.s32.totalorder %v3238_v17, 7 }
  0xa2   : > { %2377 = vmatprep.subr.bf16.mxu1 %v2660_v5  ;;  %v2666_v11 = vld [vmem:[#allocation6 + $0x98] sm:$0xff]   ;;  %v2668_v15 = vld [vmem:[#allocation6 + $0x20] sm:$0xff]   ;;  %v2672_v18 = vld [vmem:[#allocation6 + $0xa8] sm:$0xff]   ;;  %vm357_vm3 = vcmp.ge.s32.totalorder %v3238_v17, 1  ;;  %p2867_p5 = pnand %p2866_p10, %p3166_p3  ;;  %s2869_s11 = sshll.u32 %s2955_s23, 4  ;;  %s2870_s11 = int_to_ptr.vmem [resolvable:$false] %s2869_s11 }
  0xa3   : > { %2184 = vmatpush3.bf16.msra.mxu0 %v2659_v4  ;;  %v2671_v19 = vld [vmem:[#allocation6 + $0x28] sm:$0xff]   ;;  %v2673_v20 = vld [vmem:[#allocation6 + $0x70] sm:$0xff]   ;;  %v2676_v24 = vld [vmem:[#allocation6 + $0x78] sm:$0xff]   ;;  %vm441_vm2 = vcmp.lt.s32.totalorder %v323_v21, 15  ;;  %s2871_s27 = scalar_lea.vmem %s2870_s11, 4096  ;;  %p2872_p12 = scmp.lt.s32.totalorder %s3820_s14, %s2870_s11 }
  0xa4   : > { %2185 = vmatprep.subr.bf16.mxu0 %v2661_v6  ;;  %v2674_v22 = vld [vmem:[#allocation6 + $0x30] sm:$0xff]   ;;  %v3242_v25 = vld [vmem:[%s3224_s7] sm:$0xff]  ;;  %v3245_v26 = vld [vmem:[%s3224_s7 + $0x8] sm:$0xff]  ;;  %p2868_p7 = pneg %p2867_p5  ;;  %p2873_p1 = scmp.lt.s32.totalorder %s2871_s27, %s2865_s16 }
  0xa5   : > { %2378 = vmatpush3.bf16.msra.mxu1 %v2660_v5  ;;  %v2675_v23 = vld [vmem:[#allocation6 + $0xb0] sm:$0xff]   ;;  %v3248_v27 = vld [vmem:[%s3224_s7 + $0x78] sm:$0xff]  ;;  %v324_v28 = vrot.slane %v3242_v25, 7  ;;  %v325_v29 = vrot.slane %v3245_v26, 7  ;;  %v391_v30 = vpack.c.bf16 %v3245_v26, %v3242_v25  ;;  %v407_v35 = vrot.slane %v3242_v25, 1  ;;  %v3264_v38 = vld [vmem:[%s3224_s7 + $0x20] sm:$0xff] }
  0xa6   : > { %2379 = vmatprep.subr.bf16.mxu1 %v2663_v8  ;;  %v339_v31 = vrot.slane %v3248_v27, 7  ;;  %v307_v32 = vld [vmem:[%s3224_s7 + $0x10] sm:$0xff]  ;;  %v3259_v33 = vld [vmem:[%s3224_s7 + $0x18] sm:$0xff]  ;;  %v408_v36 = vrot.slane %v3245_v26, 1  ;;  %v411_v43 = vrot.slane %v3264_v38, 1  ;;  %v3275_v44 = vld [vmem:[%s3224_s7 + $0x28] sm:$0xff]  ;;  %p2874_p2 = por %p2873_p1, %p2872_p12 }
  0xa7   : > { %2186 = vmatpush3.bf16.msra.mxu0 %v2662_v7  ;;  %v2678_v34 = vld [vmem:[#allocation6 + $0xb8] sm:$0xff]   ;;  %v409_v37 = vrot.slane %v307_v32, 1  ;;  %v410_v39 = vrot.slane %v3259_v33, 1  ;;  %722 = vmatprep.mubr.bf16.mxu0 %v391_v30  ;;  %v355_v41 = vsel %vm340_vm0, %v324_v28, %v325_v29  ;;  %vm3285_vm5 = vmpackc.low %vm441_vm2, %vm2950_vm4  ;;  %v3290_v48 = vld [vmem:[%s3224_s7 + $0x30] sm:$0xff]  ;;  %v412_v55 = vrot.slane %v3275_v44, 1 }
  0xa8   : > { %2187 = vmatprep.subr.bf16.mxu0 %v2664_v9  ;;  %v2677_v40 = vld [vmem:[#allocation6 + $0x38] sm:$0xff]   ;;  %v356_v42 = vsel %vm340_vm0, %v339_v31, %v324_v28  ;;  %v438_v46 = vsel %vm423_vm1, %v407_v35, %v408_v36  ;;  %v3300_v53 = vld [vmem:[%s3224_s7 + $0x40] sm:$0xff]  ;;  %vm3305_vm6 = vmpackc.low %vm2950_vm4, %vm357_vm3  ;;  %v392_v57 = vpack.c.bf16 %v3259_v33, %v307_v32  ;;  %v326_v58 = vrot.slane %v307_v32, 7  ;;  %p2875_p13 = pnand %p2874_p2, %p2868_p7 }
  0xa9   : > { %2380 = vmatpush3.bf16.msra.mxu1 %v2663_v8  ;;  %v437_v45 = vsel %vm423_vm1, %v408_v36, %v409_v37  ;;  %v435_v50 = vsel %vm423_vm1, %v410_v39, %v411_v43  ;;  %v436_v51 = vsel %vm423_vm1, %v409_v37, %v410_v39  ;;  %v3297_v52 = vld [vmem:[%s3224_s7 + $0x38] sm:$0xff]  ;;  %v2086_v54 = vpack.c.bf16 %v355_v41, %v356_v42  ;;  %v3315_v61 = vld [vmem:[%s3224_s7 + $0x48] sm:$0xff]  ;;  %v3318_v62 = vld [vmem:[%s3224_s7 + $0x50] sm:$0xff] }
  0xaa   : > { %2381 = vmatprep.subr.bf16.mxu1 %v2666_v11  ;;  %v2110_v49 = vpack.c.bf16 %v437_v45, %v438_v46  ;;  %v327_v59 = vrot.slane %v3259_v33, 7  ;;  %v413_v60 = vrot.slane %v3290_v48, 1  ;;  %v2679_v63 = vld [vmem:[#allocation8 + $0x80] sm:$0xff]   ;;  %v2113_v0 = vpack.c.bf16 %v435_v50, %v436_v51  ;;  %v1547_v56 = vld [vmem:[#allocation9 + $0x28] sm:$0xff] }
  0xab   : > { %2188 = vmatpush3.bf16.msra.mxu0 %v2665_v10  ;;  %v434_v1 = vsel %vm423_vm1, %v411_v43, %v412_v55  ;;  %v414_v2 = vrot.slane %v3297_v52, 1  ;;  %v415_v3 = vrot.slane %v3300_v53, 1  ;;  %v354_v7 = vsel %vm340_vm0, %v325_v29, %v326_v58  ;;  %v3337_v10 = vld [vmem:[%s3224_s7 + $0x58] sm:$0xff]  ;;  %v1542_v47 = vld [vmem:[#allocation9] sm:$0xff] }
  0xac   : > { %2189 = vmatprep.subr.bf16.mxu0 %v2667_v12  ;;  %2391 = vmatprep.mubr.msk.bf16.mxu1 %vm3285_vm5, %v2110_v49  ;;  %v433_v4 = vsel %vm423_vm1, %v412_v55, %v413_v60  ;;  %v353_v6 = vsel %vm340_vm0, %v326_v58, %v327_v59  ;;  %v416_v8 = vrot.slane %v3315_v61, 1  ;;  %v417_v9 = vrot.slane %v3318_v62, 1 }
  0xad   : > { %2382 = vmatpush3.bf16.msra.mxu1 %v2666_v11  ;;  %v2116_v5 = vpack.c.bf16 %v433_v4, %v434_v1  ;;  %v3340_v11 = vld [vmem:[%s3224_s7 + $0x60] sm:$0xff]  ;;  %v329_v12 = vrot.slane %v3275_v44, 7  ;;  %v328_v13 = vrot.slane %v3264_v38, 7  ;;  %v393_v21 = vpack.c.bf16 %v3275_v44, %v3264_v38 }
  0xae   : > { %2383 = vmatprep.subr.bf16.mxu1 %v2669_v14  ;;  %v418_v26 = vrot.slane %v3337_v10, 1  ;;  %v419_v28 = vrot.slane %v3340_v11, 1  ;;  %v330_v29 = vrot.slane %v3290_v48, 7  ;;  %v331_v36 = vrot.slane %v3297_v52, 7 }
  0xaf   : > { %2190 = vmatpush3.bf16.msra.mxu0 %v2668_v15  ;;  %v432_v15 = vsel %vm423_vm1, %v413_v60, %v414_v2  ;;  %v351_v33 = vsel %vm340_vm0, %v328_v13, %v329_v12  ;;  %v422_v37 = vrot.slane %v3248_v27, 1  ;;  %v394_v43 = vpack.c.bf16 %v3297_v52, %v3290_v48 }
  0xb0   : > { %2191 = vmatprep.subr.bf16.mxu0 %v2670_v16  ;;  %v3351_v16 = vld [vmem:[%s3224_s7 + $0x68] sm:$0xff]  ;;  %v427_v38 = vsel %vm423_vm1, %v418_v26, %v419_v28  ;;  %v428_v39 = vsel %vm423_vm1, %v417_v9, %v418_v26  ;;  %v349_v46 = vsel %vm340_vm0, %v330_v29, %v331_v36  ;;  %v350_v49 = vsel %vm340_vm0, %v329_v12, %v330_v29  ;;  %v2681_v12 = vld [vmem:[#allocation8 + $0x90] sm:$0xff]   ;;  %v2695_v26 = vld [vmem:[#allocation8 + $0x60] sm:$0xff]  }
  0xb1   : > { %2384 = vmatpush3.bf16.msra.mxu1 %v2669_v14  ;;  %v431_v14 = vsel %vm423_vm1, %v414_v2, %v415_v3  ;;  %v420_v30 = vrot.slane %v3351_v16, 1  ;;  %v2125_v44 = vpack.c.bf16 %v427_v38, %v428_v39  ;;  %v439_v50 = vsel %vm423_vm1, %v422_v37, %v407_v35  ;;  %v2697_v29 = vld [vmem:[#allocation8 + $0x68] sm:$0xff]  }
  0xb2   : > { %2385 = vmatprep.subr.bf16.mxu1 %v2672_v18  ;;  %v2095_v51 = vpack.c.bf16 %v349_v46, %v350_v49  ;;  %v333_v52 = vrot.slane %v3315_v61, 7  ;;  %v332_v55 = vrot.slane %v3300_v53, 7  ;;  %v335_v60 = vrot.slane %v3337_v10, 7 }
  0xb3   : > { %2192 = vmatpush3.bf16.msra.mxu0 %v2671_v19  ;;  %v2089_v19 = vpack.c.bf16 %v353_v6, %v354_v7  ;;  %v426_v42 = vsel %vm423_vm1, %v419_v28, %v420_v30  ;;  %v337_v1 = vrot.slane %v3351_v16, 7  ;;  %v397_v2 = vpack.c.bf16 %v3351_v16, %v3340_v11  ;;  %v2687_v16 = vld [vmem:[#allocation8 + $0x40] sm:$0xff]  }
  0xb4   : > { %2193 = vmatprep.subr.bf16.mxu0 %v2673_v20  ;;  %v429_v20 = vsel %vm423_vm1, %v416_v8, %v417_v9  ;;  %v347_v58 = vsel %vm340_vm0, %v332_v55, %v333_v52  ;;  %v348_v25 = vsel %vm340_vm0, %v331_v36, %v332_v55  ;;  %v2696_v28 = vld [vmem:[#allocation8 + $0x20] sm:$0xff]   ;;  %v2702_v36 = vld [vmem:[#allocation8 + $0x38] sm:$0xff]  }
  0xb5   : > { %2386 = vmatpush3.bf16.msra.mxu1 %v2672_v18  ;;  %v3354_v18 = vld [vmem:[%s3224_s7 + $0x70] sm:$0xff]  ;;  %v2098_v35 = vpack.c.bf16 %v347_v58, %v348_v25 }
  0xb6   : > { %2387 = vmatprep.subr.bf16.mxu1 %v2675_v23  ;;  %v421_v32 = vrot.slane %v3354_v18, 1  ;;  %v398_v6 = vpack.c.bf16 %v3248_v27, %v3354_v18  ;;  %v338_v7 = vrot.slane %v3354_v18, 7  ;;  %v2683_v27 = vld [vmem:[#allocation8 + $0xa0] sm:$0xff]  }
  0xb7   : > { %2194 = vmatpush3.bf16.msra.mxu0 %v2674_v22  ;;  %v430_v22 = vsel %vm423_vm1, %v415_v3, %v416_v8  ;;  %v2688_v18 = vld [vmem:[#allocation8] sm:$0xff]  }
  0xb8   : > { %2195 = vmatprep.subr.bf16.mxu0 %v2676_v24  ;;  %v2122_v24 = vpack.c.bf16 %v429_v20, %v430_v22  ;;  %v425_v41 = vsel %vm423_vm1, %v420_v30, %v421_v32  ;;  %v424_v48 = vsel %vm423_vm1, %v421_v32, %v422_v37  ;;  %v341_v8 = vsel %vm340_vm0, %v338_v7, %v339_v31  ;;  %v2684_v31 = vld [vmem:[#allocation8 + $0xa8] sm:$0xff]   ;;  %v2692_v22 = vld [vmem:[#allocation8 + $0x10] sm:$0xff]  }
  0xb9   : > { %2388 = vmatpush3.bf16.msra.mxu1 %v2675_v23  ;;  %v2119_v23 = vpack.c.bf16 %v431_v14, %v432_v15  ;;  %v2128_v45 = vpack.c.bf16 %v425_v41, %v426_v42  ;;  %v342_v9 = vsel %vm340_vm0, %v337_v1, %v338_v7  ;;  %v2685_v14 = vld [vmem:[#allocation8 + $0xb0] sm:$0xff]   ;;  %v2686_v15 = vld [vmem:[#allocation8 + $0xb8] sm:$0xff]   ;;  %v2690_v20 = vld [vmem:[#allocation8 + $0x8] sm:$0xff]  }
  0xba   : > { %2389 = vmatprep.subr.bf16.mxu1 %v2678_v34  ;;  %v2698_v30 = vld [vmem:[#allocation8 + $0x28] sm:$0xff]   ;;  %v2699_v32 = vld [vmem:[#allocation8 + $0x70] sm:$0xff]  }
  0xbb   : > { %2196 = vmatpush3.bf16.msra.mxu0 %v2677_v40 }
  0xbc   : > { %2407 = vmatprep.subr.bf16.mxu0 %v2679_v63 }
  0xbd   : > { %2390 = vmatpush3.bf16.msra.mxu1 %v2678_v34  ;;  %v352_v34 = vsel %vm340_vm0, %v327_v59, %v328_v13  ;;  %v396_v59 = vpack.c.bf16 %v3337_v10, %v3318_v62  ;;  %v2107_v10 = vpack.c.bf16 %v341_v8, %v342_v9  ;;  %v2682_v13 = vld [vmem:[#allocation8 + $0x98] sm:$0xff]  }
  0xbe   : > { %2087 = vmatmul.mubr.msk.bf16.vlgmr.msra.gmra.mrb[0].mxu0 %vm3305_vm6, %v2086_v54  ;;  %v2092_v40 = vpack.c.bf16 %v351_v33, %v352_v34  ;;  %v395_v54 = vpack.c.bf16 %v3315_v61, %v3300_v53  ;;  %v334_v53 = vrot.slane %v3318_v62, 7  ;;  %v336_v62 = vrot.slane %v3340_v11, 7  ;;  %v2680_v11 = vld [vmem:[#allocation8 + $0x88] sm:$0xff]   ;;  %2261 = vmatprep.subr.bf16.mxu1 %v2687_v16  ;;  %v2700_v33 = vld [vmem:[#allocation8 + $0x30] sm:$0xff]   ;;  %v2701_v34 = vld [vmem:[#allocation8 + $0x78] sm:$0xff]  }
  0xbf   : > { %730 = vmatprep.mubr.bf16.mxu0 %v392_v57  ;;  %2408 = vmatpush3.bf16.msra.mxu0 %v2679_v63  ;;  %v2131_v57 = vpack.c.bf16 %v439_v50, %v424_v48 }
  0xc0   : > { %2392 = vmatmul.mubr.msk.bf16.vlgmr.msra.gmra.mrb[0].mxu1 %vm3285_vm5, %v2113_v0  ;;  %v345_v61 = vsel %vm340_vm0, %v334_v53, %v335_v60  ;;  %v346_v63 = vsel %vm340_vm0, %v333_v52, %v334_v53  ;;  %v343_v3 = vsel %vm340_vm0, %v336_v62, %v337_v1  ;;  %v344_v4 = vsel %vm340_vm0, %v335_v60, %v336_v62 }
  0xc1   : > { %2395 = vmatprep.mubr.msk.bf16.mxu1 %vm3285_vm5, %v2116_v5  ;;  %v2101_v0 = vpack.c.bf16 %v345_v61, %v346_v63  ;;  %v2104_v5 = vpack.c.bf16 %v343_v3, %v344_v4  ;;  %2409 = vmatprep.subr.bf16.mxu0 %v2680_v11 }
  0xc2   : > { %2262 = vmatpush3.bf16.msra.mxu1 %v2688_v18 }
  0xc3   : > { %2410 = vmatpush3.bf16.msra.mxu0 %v2680_v11 }
  0xc4   : > { %2411 = vmatprep.subr.bf16.mxu0 %v2681_v12 }
  0xc6   : > { %2090 = vmatmul.mubr.msk.bf16.gmra.mrb[4].mxu0 %vm3305_vm6, %v2089_v19  ;;  %v2689_v19 = vld [vmem:[#allocation8 + $0x48] sm:$0xff]  }
  0xc7   : > { %738 = vmatprep.mubr.bf16.mxu0 %v393_v21  ;;  %2412 = vmatpush3.bf16.msra.mxu0 %v2681_v12  ;;  %v2691_v21 = vld [vmem:[#allocation8 + $0x50] sm:$0xff]  }
  0xc8   : > { %2396 = vmatmul.mubr.msk.bf16.gmra.mrb[4].mxu1 %vm3285_vm5, %v2119_v23  ;;  %2413 = vmatprep.subr.bf16.mxu0 %v2682_v13  ;;  %v2693_v23 = vld [vmem:[#allocation8 + $0x58] sm:$0xff]  }
  0xc9   : > { %2399 = vmatprep.mubr.msk.bf16.mxu1 %vm3285_vm5, %v2122_v24  ;;  %2263 = vmatprep.subr.bf16.mxu1 %v2689_v19  ;;  %v2694_v24 = vld [vmem:[#allocation8 + $0x18] sm:$0xff]  }
  0xca   : > { %2264 = vmatpush3.bf16.msra.mxu1 %v2690_v20 }
  0xcb   : > { %2414 = vmatpush3.bf16.msra.mxu0 %v2682_v13  ;;  %2265 = vmatprep.subr.bf16.mxu1 %v2691_v21 }
  0xcc   : > { %2415 = vmatprep.subr.bf16.mxu0 %v2683_v27 }
  0xce   : > { %2093 = vmatmul.mubr.msk.bf16.gmra.mrb[8].mxu0 %vm3305_vm6, %v2092_v40  ;;  %2266 = vmatpush3.bf16.msra.mxu1 %v2692_v22 }
  0xcf   : > { %746 = vmatprep.mubr.bf16.mxu0 %v394_v43  ;;  %2416 = vmatpush3.bf16.msra.mxu0 %v2683_v27 }
  0xd0   : > { %2400 = vmatmul.mubr.msk.bf16.gmra.mrb[8].mxu1 %vm3285_vm5, %v2125_v44  ;;  %2417 = vmatprep.subr.bf16.mxu0 %v2684_v31 }
  0xd1   : > { %2403 = vmatprep.mubr.msk.bf16.mxu1 %vm3285_vm5, %v2128_v45  ;;  %2267 = vmatprep.subr.bf16.mxu1 %v2693_v23 }
  0xd2   : > { %2268 = vmatpush3.bf16.msra.mxu1 %v2694_v24 }
  0xd3   : > { %2418 = vmatpush3.bf16.msra.mxu0 %v2684_v31  ;;  %2269 = vmatprep.subr.bf16.mxu1 %v2695_v26 }
  0xd4   : > { %2419 = vmatprep.subr.bf16.mxu0 %v2685_v14 }
  0xd6   : > { %2096 = vmatmul.mubr.msk.bf16.gmra.mrb[12].mxu0 %vm3305_vm6, %v2095_v51  ;;  %2270 = vmatpush3.bf16.msra.mxu1 %v2696_v28 }
  0xd7   : > { %754 = vmatprep.mubr.bf16.mxu0 %v395_v54  ;;  %2420 = vmatpush3.bf16.msra.mxu0 %v2685_v14 }
  0xd8   : > { %2404 = vmatmul.mubr.msk.bf16.gmra.mrb[12].mxu1 %vm3285_vm5, %v2131_v57  ;;  %2421 = vmatprep.subr.bf16.mxu0 %v2686_v15 }
  0xd9   : > { %2271 = vmatprep.subr.bf16.mxu1 %v2697_v29 }
  0xda   : > { %2272 = vmatpush3.bf16.msra.mxu1 %v2698_v30 }
  0xdb   : > { %2422 = vmatpush3.bf16.msra.mxu0 %v2686_v15  ;;  %2273 = vmatprep.subr.bf16.mxu1 %v2699_v32 }
  0xde   : > { %2099 = vmatmul.mubr.msk.bf16.gmra.mrb[16].mxu0 %vm3305_vm6, %v2098_v35  ;;  %2274 = vmatpush3.bf16.msra.mxu1 %v2700_v33 }
  0xdf   : > { %762 = vmatprep.mubr.bf16.mxu0 %v396_v59  ;;  %2275 = vmatprep.subr.bf16.mxu1 %v2701_v34 }
  0xe2   : > { %2276 = vmatpush3.bf16.msra.mxu1 %v2702_v36 }
  0xe6   : > { %2102 = vmatmul.mubr.msk.bf16.gmra.mrb[20].mxu0 %vm3305_vm6, %v2101_v0 }
  0xe7   : > { %770 = vmatprep.mubr.bf16.mxu0 %v397_v2 }
  0xee   : > { %2105 = vmatmul.mubr.msk.bf16.gmra.mrb[24].mxu0 %vm3305_vm6, %v2104_v5 }
  0xef   : > { %778 = vmatprep.mubr.bf16.mxu0 %v398_v6 }
  0xf6   : > { %2108 = vmatmul.mubr.msk.bf16.gmra.mrb[28].mxu0 %vm3305_vm6, %v2107_v10 }
 0x191   : > { %v2197_v37 = vpop.f32.mrb[0].mxu0 }
 0x192   : > { %v2198_v38 = vpop.f32.mrb[1].mxu0 }
 0x193   : > { %v2199_v39 = vadd.f32 %v2198_v38, %v2197_v37  ;;  %v2200_v40 = vpop.f32.mrb[2].mxu0  ;;  %v2393_v41 = vpop.f32.mrb[0].mxu1 }
 0x194   : > { %v2201_v42 = vpop.f32.mrb[3].mxu0  ;;  %v821_v43 = vpop.f32.mrb[1].mxu1 }
 0x195   : > { %v2202_v44 = vadd.f32 %v2201_v42, %v2200_v40  ;;  %v822_v45 = vadd.f32 %v2199_v39, %v821_v43  ;;  %v2394_v46 = vpop.f32.mrb[2].mxu1 }
 0x196   : > { %v824_v49 = vpop.f32.mrb[3].mxu1 }
 0x197   : > { %vm884_vm7 = vcmp.gt.f32.partialorder %v822_v45, 0.0  ;;  %v900_v48 = vmul.f32 0.25, %v822_v45  ;;  %v825_v50 = vadd.f32 %v2202_v44, %v824_v49 }
 0x199   : > { %v3450_v51 = vsel %vm884_vm7, %v822_v45, %v900_v48  ;;  %vm885_vm8 = vcmp.gt.f32.partialorder %v825_v50, 0.0  ;;  %v901_v52 = vmul.f32 0.25, %v825_v50  ;;  %v2203_v54 = vpop.f32.mrb[4].mxu0 }
 0x19a   : > { %v2204_v55 = vpop.f32.mrb[5].mxu0  ;;  %v932_v57 = vrot.slane %v3450_v51, 7  ;;  %v1012_v53 = vrot.slane %v3450_v51, 1 }
 0x19b   : > { %v917_v58 = vsel %vm885_vm8, %v825_v50, %v901_v52  ;;  %v2205_v25 = vadd.f32 %v2204_v55, %v2203_v54  ;;  %v2206_v35 = vpop.f32.mrb[6].mxu0  ;;  %v3453_v59 = vpop.f32.mrb[4].mxu1 }
 0x19c   : > { %v933_v60 = vrot.slane %v917_v58, 7  ;;  %v1013_v61 = vrot.slane %v917_v58, 1  ;;  %v2207_v63 = vpop.f32.mrb[7].mxu0  ;;  %v996_v0 = vpack.c.bf16 %v917_v58, %v3450_v51  ;;  %v837_v1 = vpop.f32.mrb[5].mxu1  ;;  %v1543_v51 = vld [vmem:[#allocation9 + $0x8] sm:$0xff] }
 0x19d   : > { %v830_v2 = vadd.f32 %v2393_v41, %v2205_v25  ;;  %v2208_v62 = vadd.f32 %v2207_v63, %v2206_v35  ;;  %v3457_v3 = vpop.f32.mrb[6].mxu1 }
 0x19e   : > { %v3463_v4 = vsel %vm340_vm0, %v932_v57, %v933_v60  ;;  %1324 = vmatprep.mubr.bf16.mxu1 %v996_v0  ;;  %v840_v5 = vpop.f32.mrb[7].mxu1  ;;  %v1042_v6 = vsel %vm423_vm1, %v1012_v53, %v1013_v61 }
 0x19f   : > { %vm886_vm9 = vcmp.gt.f32.partialorder %v830_v2, 0.0  ;;  %v902_v7 = vmul.f32 0.25, %v830_v2  ;;  %v833_v8 = vadd.f32 %v2394_v46, %v2208_v62 }
 0x1a1   : > { %v3469_v9 = vsel %vm886_vm9, %v830_v2, %v902_v7  ;;  %vm887_vm10 = vcmp.gt.f32.partialorder %v833_v8, 0.0  ;;  %v903_v10 = vmul.f32 0.25, %v833_v8  ;;  %v2209_v11 = vpop.f32.mrb[8].mxu0 }
 0x1a2   : > { %v934_v12 = vrot.slane %v3469_v9, 7  ;;  %v1014_v13 = vrot.slane %v3469_v9, 1  ;;  %v2210_v27 = vpop.f32.mrb[9].mxu0 }
 0x1a3   : > { %v3473_v31 = vsel %vm887_vm10, %v833_v8, %v903_v10  ;;  %v2211_v14 = vadd.f32 %v2210_v27, %v2209_v11  ;;  %v2212_v15 = vpop.f32.mrb[10].mxu0  ;;  %v3475_v16 = vpop.f32.mrb[8].mxu1 }
 0x1a4   : > { %v935_v18 = vrot.slane %v3473_v31, 7  ;;  %v1015_v19 = vrot.slane %v3473_v31, 1  ;;  %v2213_v20 = vpop.f32.mrb[11].mxu0  ;;  %v1041_v21 = vsel %vm423_vm1, %v1013_v61, %v1014_v13  ;;  %v853_v22 = vpop.f32.mrb[9].mxu1  ;;  %v997_v23 = vpack.c.bf16 %v3473_v31, %v3469_v9  ;;  %v1545_v9 = vld [vmem:[#allocation9 + $0x18] sm:$0xff] }
 0x1a5   : > { %v2214_v24 = vadd.f32 %v2213_v20, %v2212_v15  ;;  %v838_v26 = vadd.f32 %v2211_v14, %v837_v1  ;;  %v2158_v28 = vpack.c.bf16 %v1041_v21, %v1042_v6  ;;  %v3483_v29 = vpop.f32.mrb[10].mxu1  ;;  %v3487_v30 = vsel %vm340_vm0, %v933_v60, %v934_v12 }
 0x1a6   : > { %v1040_v32 = vsel %vm423_vm1, %v1014_v13, %v1015_v19  ;;  %v856_v33 = vpop.f32.mrb[11].mxu1  ;;  %v3493_v34 = vsel %vm340_vm0, %v934_v12, %v935_v18 }
 0x1a7   : > { %vm888_vm11 = vcmp.gt.f32.partialorder %v838_v26, 0.0  ;;  %v904_v36 = vmul.f32 0.25, %v838_v26  ;;  %v841_v37 = vadd.f32 %v2214_v24, %v840_v5  ;;  %2423 = vmatprep.mubr.msk.bf16.mxu0 %vm3285_vm5, %v2158_v28  ;;  %v2137_v38 = vpack.c.bf16 %v3493_v34, %v3487_v30  ;;  %v1548_v34 = vld [vmem:[#allocation9 + $0x30] sm:$0xff] }
 0x1a9   : > { %v3499_v39 = vsel %vm888_vm11, %v838_v26, %v904_v36  ;;  %vm889_vm12 = vcmp.gt.f32.partialorder %v841_v37, 0.0  ;;  %v905_v40 = vmul.f32 0.25, %v841_v37  ;;  %v2215_v41 = vpop.f32.mrb[12].mxu0  ;;  %vm1572_vm11 = vcmask 1044484  }
 0x1aa   : > { %v936_v42 = vrot.slane %v3499_v39, 7  ;;  %v1016_v43 = vrot.slane %v3499_v39, 1  ;;  %v2216_v44 = vpop.f32.mrb[13].mxu0 }
 0x1ab   : > { %v3503_v45 = vsel %vm889_vm12, %v841_v37, %v905_v40  ;;  %v2217_v46 = vadd.f32 %v2216_v44, %v2215_v41  ;;  %v2218_v49 = vpop.f32.mrb[14].mxu0  ;;  %v3505_v48 = vpop.f32.mrb[12].mxu1  ;;  %vm1574_vm12 = vcmask 1045509  }
 0x1ac   : > { %v1039_v50 = vsel %vm423_vm1, %v1015_v19, %v1016_v43  ;;  %v937_v52 = vrot.slane %v3503_v45, 7  ;;  %v1017_v54 = vrot.slane %v3503_v45, 1  ;;  %v2219_v55 = vpop.f32.mrb[15].mxu0  ;;  %v3511_v58 = vpop.f32.mrb[13].mxu1  ;;  %v998_v25 = vpack.c.bf16 %v3503_v45, %v3499_v39  ;;  %v1550_v45 = vld [vmem:[#allocation9 + $0x40] sm:$0xff] }
 0x1ad   : > { %v2161_v35 = vpack.c.bf16 %v1039_v50, %v1040_v32  ;;  %v846_v60 = vadd.f32 %v3453_v59, %v2217_v46  ;;  %v2220_v61 = vadd.f32 %v2219_v55, %v2218_v49  ;;  %v3516_v63 = vpop.f32.mrb[14].mxu1  ;;  %v3520_v0 = vsel %vm340_vm0, %v935_v18, %v936_v42 }
 0x1ae   : > { %v1038_v1 = vsel %vm423_vm1, %v1016_v43, %v1017_v54  ;;  %v3524_v2 = vpop.f32.mrb[15].mxu1  ;;  %v3528_v62 = vsel %vm340_vm0, %v936_v42, %v937_v52 }
 0x1af   : > { %vm890_vm13 = vcmp.gt.f32.partialorder %v846_v60, 0.0  ;;  %v906_v5 = vmul.f32 0.25, %v846_v60  ;;  %v849_v59 = vadd.f32 %v3457_v3, %v2220_v61  ;;  %2424 = vmatmul.mubr.msk.bf16.vlgmr.msra.gmra.mrb[32].mxu0 %vm3285_vm5, %v2161_v35  ;;  %v2140_v6 = vpack.c.bf16 %v3528_v62, %v3520_v0  ;;  %v1552_v62 = vld [vmem:[#allocation9 + $0x50] sm:$0xff] }
 0x1b1   : > { %v3535_v7 = vsel %vm890_vm13, %v846_v60, %v906_v5  ;;  %vm891_vm14 = vcmp.gt.f32.partialorder %v849_v59, 0.0  ;;  %v907_v8 = vmul.f32 0.25, %v849_v59  ;;  %v2221_v10 = vpop.f32.mrb[16].mxu0  ;;  %vm1576_vm13 = vcmask 1046534  }
 0x1b2   : > { %v938_v11 = vrot.slane %v3535_v7, 7  ;;  %v1018_v12 = vrot.slane %v3535_v7, 1  ;;  %v2222_v13 = vpop.f32.mrb[17].mxu0 }
 0x1b3   : > { %v3539_v27 = vsel %vm891_vm14, %v849_v59, %v907_v8  ;;  %v2223_v14 = vadd.f32 %v2222_v13, %v2221_v10  ;;  %v2224_v3 = vpop.f32.mrb[18].mxu0  ;;  %vm1578_vm14 = vcmask 1047559  }
 0x1b4   : > { %v939_v15 = vrot.slane %v3539_v27, 7  ;;  %v1019_v18 = vrot.slane %v3539_v27, 1  ;;  %v2225_v19 = vpop.f32.mrb[19].mxu0  ;;  %v1037_v20 = vsel %vm423_vm1, %v1017_v54, %v1018_v12  ;;  %v999_v21 = vpack.c.bf16 %v3539_v27, %v3535_v7  ;;  %v1554_v27 = vld [vmem:[#allocation9 + $0x60] sm:$0xff] }
 0x1b5   : > { %v2226_v24 = vadd.f32 %v2225_v19, %v2224_v3  ;;  %v854_v26 = vadd.f32 %v2223_v14, %v853_v22  ;;  %v2164_v28 = vpack.c.bf16 %v1037_v20, %v1038_v1  ;;  %v3549_v32 = vsel %vm340_vm0, %v937_v52, %v938_v11 }
 0x1b6   : > { %v1036_v36 = vsel %vm423_vm1, %v1018_v12, %v1019_v18  ;;  %v3555_v37 = vsel %vm340_vm0, %v938_v11, %v939_v15 }
 0x1b7   : > { %vm892_vm15 = vcmp.gt.f32.partialorder %v854_v26, 0.0  ;;  %v908_v40 = vmul.f32 0.25, %v854_v26  ;;  %v857_v41 = vadd.f32 %v2226_v24, %v856_v33  ;;  %2427 = vmatprep.mubr.msk.bf16.mxu0 %vm3285_vm5, %v2164_v28  ;;  %v2143_v22 = vpack.c.bf16 %v3555_v37, %v3549_v32  ;;  %v1556_v37 = vld [vmem:[#allocation9 + $0x70] sm:$0xff] }
 0x1b9   : > { %v3561_v42 = vsel %vm892_vm15, %v854_v26, %v908_v40  ;;  %vm893_vm2 = vcmp.gt.f32.partialorder %v857_v41, 0.0  ;;  %v909_v43 = vmul.f32 0.25, %v857_v41  ;;  %v2227_v44 = vpop.f32.mrb[20].mxu0 }
 0x1ba   : > { %v940_v46 = vrot.slane %v3561_v42, 7  ;;  %v1020_v49 = vrot.slane %v3561_v42, 1  ;;  %v2228_v50 = vpop.f32.mrb[21].mxu0 }
 0x1bb   : > { %v3565_v52 = vsel %vm893_vm2, %v857_v41, %v909_v43  ;;  %v2229_v54 = vadd.f32 %v2228_v50, %v2227_v44  ;;  %v2230_v33 = vpop.f32.mrb[22].mxu0 }
 0x1bc   : > { %v941_v55 = vrot.slane %v3565_v52, 7  ;;  %v1021_v35 = vrot.slane %v3565_v52, 1  ;;  %v2231_v60 = vpop.f32.mrb[23].mxu0  ;;  %v1035_v61 = vsel %vm423_vm1, %v1019_v18, %v1020_v49  ;;  %v1000_v1 = vpack.c.bf16 %v3565_v52, %v3561_v42 }
 0x1bd   : > { %v862_v5 = vadd.f32 %v3475_v16, %v2229_v54  ;;  %v2232_v59 = vadd.f32 %v2231_v60, %v2230_v33  ;;  %v2167_v8 = vpack.c.bf16 %v1035_v61, %v1036_v36  ;;  %v3576_v10 = vsel %vm340_vm0, %v939_v15, %v940_v46 }
 0x1be   : > { %v1034_v11 = vsel %vm423_vm1, %v1020_v49, %v1021_v35  ;;  %v3582_v12 = vsel %vm340_vm0, %v940_v46, %v941_v55  ;;  %v2953_v52 = vmov 0.0  }
 0x1bf   : > { %vm894_vm3 = vcmp.gt.f32.partialorder %v862_v5, 0.0  ;;  %v910_v13 = vmul.f32 0.25, %v862_v5  ;;  %v865_v14 = vadd.f32 %v3483_v29, %v2232_v59  ;;  %2428 = vmatmul.mubr.msk.bf16.gmra.mrb[36].mxu0 %vm3285_vm5, %v2167_v8  ;;  %v2146_v16 = vpack.c.bf16 %v3582_v12, %v3576_v10  ;;  %v1653_v10 = vld [vmem:[#allocation11 + $0x8] sm:$0xff]  ;;  %v1654_v12 = vld [vmem:[#allocation11 + $0x10] sm:$0xff] }
 0x1c1   : > { %v3589_v3 = vsel %vm894_vm3, %v862_v5, %v910_v13  ;;  %vm895_vm4 = vcmp.gt.f32.partialorder %v865_v14, 0.0  ;;  %v911_v15 = vmul.f32 0.25, %v865_v14  ;;  %v2233_v18 = vpop.f32.mrb[24].mxu0 }
 0x1c2   : > { %v942_v19 = vrot.slane %v3589_v3, 7  ;;  %v1022_v20 = vrot.slane %v3589_v3, 1  ;;  %v2234_v24 = vpop.f32.mrb[25].mxu0 }
 0x1c3   : > { %v3593_v26 = vsel %vm895_vm4, %v865_v14, %v911_v15  ;;  %v2235_v28 = vadd.f32 %v2234_v24, %v2233_v18  ;;  %v2236_v29 = vpop.f32.mrb[26].mxu0 }
 0x1c4   : > { %v943_v36 = vrot.slane %v3593_v26, 7  ;;  %v1023_v40 = vrot.slane %v3593_v26, 1  ;;  %v2237_v41 = vpop.f32.mrb[27].mxu0  ;;  %v1033_v43 = vsel %vm423_vm1, %v1021_v35, %v1022_v20  ;;  %v1001_v44 = vpack.c.bf16 %v3593_v26, %v3589_v3  ;;  %v1655_v3 = vld [vmem:[#allocation11 + $0x18] sm:$0xff] }
 0x1c5   : > { %v2238_v46 = vadd.f32 %v2237_v41, %v2236_v29  ;;  %v870_v49 = vadd.f32 %v2235_v28, %v3511_v58  ;;  %v2170_v50 = vpack.c.bf16 %v1033_v43, %v1034_v11  ;;  %v3604_v54 = vsel %vm340_vm0, %v941_v55, %v942_v19 }
 0x1c6   : > { %v1032_v33 = vsel %vm423_vm1, %v1022_v20, %v1023_v40  ;;  %v3610_v60 = vsel %vm340_vm0, %v942_v19, %v943_v36  ;;  %v2537_v26 = vpack.c.bf16 %v1655_v3, %v1654_v12 }
 0x1c7   : > { %vm896_vm7 = vcmp.gt.f32.partialorder %v870_v49, 0.0  ;;  %v912_v35 = vmul.f32 0.25, %v870_v49  ;;  %v873_v61 = vadd.f32 %v2238_v46, %v3524_v2  ;;  %2431 = vmatprep.mubr.msk.bf16.mxu0 %vm3285_vm5, %v2170_v50  ;;  %v2149_v58 = vpack.c.bf16 %v3610_v60, %v3604_v54 }
 0x1c9   : > { %v928_v5 = vsel %vm896_vm7, %v870_v49, %v912_v35  ;;  %vm897_vm8 = vcmp.gt.f32.partialorder %v873_v61, 0.0  ;;  %v913_v55 = vmul.f32 0.25, %v873_v61  ;;  %v2239_v59 = vpop.f32.mrb[28].mxu0 }
 0x1ca   : > { %v944_v8 = vrot.slane %v928_v5, 7  ;;  %v1024_v11 = vrot.slane %v928_v5, 1  ;;  %v2240_v13 = vpop.f32.mrb[29].mxu0 }
 0x1cb   : > { %v929_v14 = vsel %vm897_vm8, %v873_v61, %v913_v55  ;;  %v2241_v15 = vadd.f32 %v2240_v13, %v2239_v59  ;;  %v2242_v18 = vpop.f32.mrb[30].mxu0 }
 0x1cc   : > { %v945_v19 = vrot.slane %v929_v14, 7  ;;  %v1025_v20 = vrot.slane %v929_v14, 1  ;;  %v2243_v24 = vpop.f32.mrb[31].mxu0  ;;  %v1031_v2 = vsel %vm423_vm1, %v1023_v40, %v1024_v11  ;;  %v1002_v28 = vpack.c.bf16 %v929_v14, %v928_v5 }
 0x1cd   : > { %v878_v29 = vadd.f32 %v3505_v48, %v2241_v15  ;;  %v2244_v41 = vadd.f32 %v2243_v24, %v2242_v18  ;;  %v2173_v43 = vpack.c.bf16 %v1031_v2, %v1032_v33  ;;  %v951_v46 = vsel %vm340_vm0, %v943_v36, %v944_v8 }
 0x1ce   : > { %v1030_v49 = vsel %vm423_vm1, %v1024_v11, %v1025_v20  ;;  %v950_v50 = vsel %vm340_vm0, %v944_v8, %v945_v19 }
 0x1cf   : > { %vm898_vm9 = vcmp.gt.f32.partialorder %v878_v29, 0.0  ;;  %v914_v54 = vmul.f32 0.25, %v878_v29  ;;  %v881_v60 = vadd.f32 %v3516_v63, %v2244_v41  ;;  %2432 = vmatmul.mubr.msk.bf16.gmra.mrb[40].mxu0 %vm3285_vm5, %v2173_v43  ;;  %v2152_v40 = vpack.c.bf16 %v950_v50, %v951_v46  ;;  %v1658_v41 = vld [vmem:[#allocation11 + $0x30] sm:$0xff]  ;;  %v1659_v43 = vld [vmem:[#allocation11 + $0x38] sm:$0xff] }
 0x1d0   : > { %v2543_v50 = vpack.c.bf16 %v1659_v43, %v1658_v41 }
 0x1d1   : > { %v930_v48 = vsel %vm898_vm9, %v878_v29, %v914_v54  ;;  %vm899_vm10 = vcmp.gt.f32.partialorder %v881_v60, 0.0  ;;  %v915_v33 = vmul.f32 0.25, %v881_v60  ;;  %v1660_v54 = vld [vmem:[#allocation11 + $0x40] sm:$0xff] }
 0x1d2   : > { %v946_v35 = vrot.slane %v930_v48, 7  ;;  %v1026_v61 = vrot.slane %v930_v48, 1 }
 0x1d3   : > { %v931_v36 = vsel %vm899_vm10, %v881_v60, %v915_v33  ;;  %v1661_v60 = vld [vmem:[#allocation11 + $0x48] sm:$0xff]  ;;  %v1663_v33 = vld [vmem:[#allocation11 + $0x58] sm:$0xff] }
 0x1d4   : > { %v947_v5 = vrot.slane %v931_v36, 7  ;;  %v1027_v55 = vrot.slane %v931_v36, 1  ;;  %v1029_v59 = vsel %vm423_vm1, %v1025_v20, %v1026_v61  ;;  %v1003_v8 = vpack.c.bf16 %v931_v36, %v930_v48  ;;  %v1662_v48 = vld [vmem:[#allocation11 + $0x50] sm:$0xff]  ;;  %v1665_v36 = vld [vmem:[#allocation11 + $0x68] sm:$0xff] }
 0x1d5   : > { %v2176_v11 = vpack.c.bf16 %v1029_v59, %v1030_v49  ;;  %v949_v63 = vsel %vm340_vm0, %v945_v19, %v946_v35 }
 0x1d6   : > { %v963_v13 = vsel %vm340_vm0, %v947_v5, %v932_v57  ;;  %v1028_v14 = vsel %vm423_vm1, %v1026_v61, %v1027_v55  ;;  %v1043_v15 = vsel %vm423_vm1, %v1027_v55, %v1012_v53  ;;  %v948_v18 = vsel %vm340_vm0, %v946_v35, %v947_v5  ;;  %v1664_v61 = vld [vmem:[#allocation11 + $0x60] sm:$0xff] }
 0x1d7   : > { %v2134_v20 = vpack.c.bf16 %v3463_v4, %v963_v13  ;;  %2435 = vmatprep.mubr.msk.bf16.mxu0 %vm3285_vm5, %v2176_v11  ;;  %v2179_v19 = vpack.c.bf16 %v1043_v15, %v1028_v14  ;;  %v2155_v24 = vpack.c.bf16 %v948_v18, %v949_v63  ;;  %v2510_v57 = vpack.c.bf16 %v1543_v51, %v1542_v47  ;;  %v1544_v4 = vld [vmem:[#allocation9 + $0x10] sm:$0xff]  ;;  %v1667_v11 = vld [vmem:[#allocation11 + $0x78] sm:$0xff] }
 0x1d8   : > { %v2951_v53 = vmov 0.0|0.0   ;;  %v2513_v31 = vpack.c.bf16 %v1545_v9, %v1544_v4  ;;  %vm2952_vm0 = vmmov 0   ;;  %v2549_v35 = vpack.c.bf16 %v1663_v33, %v1662_v48 }
 0x1d9   : > { %2135 = vmatmul.mubr.msk.bf16.vlgmr.msra.gmra.mrb[16].mxu1 %vm3305_vm6, %v2134_v20  ;;  %2436 = vmatmul.mubr.msk.bf16.gmra.mrb[44].mxu0 %vm3285_vm5, %v2179_v19  ;;  %v2552_v55 = vpack.c.bf16 %v1665_v36, %v1664_v61  ;;  %vm1566_vm1 = vcmask 1041409   ;;  %vm1568_vm5 = vcmask 1042434  }
 0x1da   : > { %1332 = vmatprep.mubr.bf16.mxu1 %v997_v23  ;;  %2509 = vmatprep.subr.bf16.mxu0 %v2951_v53  ;;  %v1546_v23 = vld [vmem:[#allocation9 + $0x20] sm:$0xff] }
 0x1db   : > { %2533 = vmatprep.subr.bf16.mxu1 %v2951_v53  ;;  %2511 = vmatpush3.bf16.msra.mxu0 %v2510_v57  ;;  %v2516_v30 = vpack.c.bf16 %v1547_v56, %v1546_v23 }
 0x1dc   : > { %2512 = vmatprep.subr.bf16.mxu0 %v2951_v53  ;;  %2471 = vmatprep.mubr.msk.f32.mxu0 %vm2952_vm0, %v2953_v52 }
 0x1df   : > { %2514 = vmatpush3.bf16.msra.mxu0 %v2513_v31 }
 0x1e0   : > { %2515 = vmatprep.subr.bf16.mxu0 %v2951_v53 }
 0x1e1   : > { %2138 = vmatmul.mubr.msk.bf16.gmra.mrb[20].mxu1 %vm3305_vm6, %v2137_v38  ;;  %v1549_v38 = vld [vmem:[#allocation9 + $0x38] sm:$0xff] }
 0x1e2   : > { %1340 = vmatprep.mubr.bf16.mxu1 %v998_v25  ;;  %v2519_v39 = vpack.c.bf16 %v1549_v38, %v1548_v34  ;;  %v1551_v25 = vld [vmem:[#allocation9 + $0x48] sm:$0xff] }
 0x1e3   : > { %2517 = vmatpush3.bf16.msra.mxu0 %v2516_v30  ;;  %v2522_v0 = vpack.c.bf16 %v1551_v25, %v1550_v45 }
 0x1e4   : > { %2518 = vmatprep.subr.bf16.mxu0 %v2951_v53 }
 0x1e7   : > { %2520 = vmatpush3.bf16.msra.mxu0 %v2519_v39 }
 0x1e8   : > { %2521 = vmatprep.subr.bf16.mxu0 %v2951_v53 }
 0x1e9   : > { %2141 = vmatmul.mubr.msk.bf16.gmra.mrb[24].mxu1 %vm3305_vm6, %v2140_v6  ;;  %v1553_v6 = vld [vmem:[#allocation9 + $0x58] sm:$0xff] }
 0x1ea   : > { %1348 = vmatprep.mubr.bf16.mxu1 %v999_v21  ;;  %v2525_v7 = vpack.c.bf16 %v1553_v6, %v1552_v62  ;;  %v1555_v21 = vld [vmem:[#allocation9 + $0x68] sm:$0xff] }
 0x1eb   : > { %2523 = vmatpush3.bf16.msra.mxu0 %v2522_v0  ;;  %v2528_v32 = vpack.c.bf16 %v1555_v21, %v1554_v27 }
 0x1ec   : > { %2524 = vmatprep.subr.bf16.mxu0 %v2951_v53 }
 0x1ef   : > { %2526 = vmatpush3.bf16.msra.mxu0 %v2525_v7 }
 0x1f0   : > { %2527 = vmatprep.subr.bf16.mxu0 %v2951_v53 }
 0x1f1   : > { %2144 = vmatmul.mubr.msk.bf16.gmra.mrb[28].mxu1 %vm3305_vm6, %v2143_v22  ;;  %v1557_v22 = vld [vmem:[#allocation9 + $0x78] sm:$0xff] }
 0x1f2   : > { %1356 = vmatprep.mubr.bf16.mxu1 %v1000_v1  ;;  %v2531_v42 = vpack.c.bf16 %v1557_v22, %v1556_v37  ;;  %v1652_v1 = vld [vmem:[#allocation11] sm:$0xff] }
 0x1f3   : > { %2529 = vmatpush3.bf16.msra.mxu0 %v2528_v32 }
 0x1f4   : > { %2530 = vmatprep.subr.bf16.mxu0 %v2951_v53 }
 0x1f7   : > { %2532 = vmatpush3.bf16.msra.mxu0 %v2531_v42 }
 0x1f9   : > { %2147 = vmatmul.mubr.msk.bf16.gmra.mrb[32].mxu1 %vm3305_vm6, %v2146_v16  ;;  %v2534_v16 = vpack.c.bf16 %v1653_v10, %v1652_v1 }
 0x1fa   : > { %1364 = vmatprep.mubr.bf16.mxu1 %v1001_v44  ;;  %v1656_v44 = vld [vmem:[#allocation11 + $0x20] sm:$0xff] }
 0x1fb   : > { %2535 = vmatpush3.bf16.msra.mxu1 %v2534_v16 }
 0x1fc   : > { %2536 = vmatprep.subr.bf16.mxu1 %v2951_v53 }
 0x1ff   : > { %2538 = vmatpush3.bf16.msra.mxu1 %v2537_v26 }
 0x200   : > { %2539 = vmatprep.subr.bf16.mxu1 %v2951_v53 }
 0x201   : > { %2150 = vmatmul.mubr.msk.bf16.gmra.mrb[36].mxu1 %vm3305_vm6, %v2149_v58  ;;  %v1657_v58 = vld [vmem:[#allocation11 + $0x28] sm:$0xff] }
 0x202   : > { %1372 = vmatprep.mubr.bf16.mxu1 %v1002_v28  ;;  %v2540_v28 = vpack.c.bf16 %v1657_v58, %v1656_v44 }
 0x204   : > { %2541 = vmatpush3.bf16.msra.mxu1 %v2540_v28 }
 0x205   : > { %2542 = vmatprep.subr.bf16.mxu1 %v2951_v53 }
 0x208   : > { %2544 = vmatpush3.bf16.msra.mxu1 %v2543_v50 }
 0x209   : > { %2153 = vmatmul.mubr.msk.bf16.gmra.mrb[40].mxu1 %vm3305_vm6, %v2152_v40  ;;  %v2546_v40 = vpack.c.bf16 %v1661_v60, %v1660_v54  ;;  %2545 = vmatprep.subr.bf16.mxu1 %v2951_v53 }
 0x20a   : > { %1380 = vmatprep.mubr.bf16.mxu1 %v1003_v8  ;;  %v1666_v8 = vld [vmem:[#allocation11 + $0x70] sm:$0xff] }
 0x20b   : > { %v2555_v14 = vpack.c.bf16 %v1667_v11, %v1666_v8 }
 0x20c   : > { %2547 = vmatpush3.bf16.msra.mxu1 %v2546_v40 }
 0x20d   : > { %2548 = vmatprep.subr.bf16.mxu1 %v2951_v53 }
 0x210   : > { %2550 = vmatpush3.bf16.msra.mxu1 %v2549_v35 }
 0x211   : > { %2156 = vmatmul.mubr.msk.bf16.gmra.mrb[44].mxu1 %vm3305_vm6, %v2155_v24  ;;  %2551 = vmatprep.subr.bf16.mxu1 %v2951_v53  ;;  %vm1570_vm6 = vcmask 1043459  }
 0x212   : > { %2506 = vmatprep.mubr.msk.f32.mxu1 %vm2952_vm0, %v2953_v52 }
 0x214   : > { %2553 = vmatpush3.bf16.msra.mxu1 %v2552_v55 }
 0x215   : > { %2554 = vmatprep.subr.bf16.mxu1 %v2951_v53 }
 0x218   : > { %2556 = vmatpush3.bf16.msra.mxu1 %v2555_v14 }
 0x282   : > { %v2425_v2 = vpop.f32.mrb[32].mxu0 }
 0x283   : > { %v1423_v29 = vpop.f32.mrb[33].mxu0 }
 0x284   : > { %v2426_v46 = vpop.f32.mrb[34].mxu0 }
 0x285   : > { %v1426_v49 = vpop.f32.mrb[35].mxu0 }
 0x292   : > { %v2429_v5 = vpop.f32.mrb[36].mxu0 }
 0x293   : > { %v1439_v59 = vpop.f32.mrb[37].mxu0 }
 0x294   : > { %v2430_v63 = vpop.f32.mrb[38].mxu0 }
 0x295   : > { %v1442_v13 = vpop.f32.mrb[39].mxu0 }
 0x2a2   : > { %v2433_v15 = vpop.f32.mrb[40].mxu0 }
 0x2a3   : > { %v1455_v18 = vpop.f32.mrb[41].mxu0 }
 0x2a4   : > { %v2434_v20 = vpop.f32.mrb[42].mxu0 }
 0x2a5   : > { %v1458_v19 = vpop.f32.mrb[43].mxu0 }
 0x2ac   : > { %v2277_v24 = vpop.f32.mrb[16].mxu1  ;;  %v3709_v47 = vpop.f32.mrb[44].mxu0 }
 0x2ad   : > { %v2278_v51 = vpop.f32.mrb[17].mxu1  ;;  %v3711_v57 = vpop.f32.mrb[45].mxu0 }
 0x2ae   : > { %v2279_v4 = vadd.f32 %v2278_v51, %v2277_v24  ;;  %v2280_v9 = vpop.f32.mrb[18].mxu1  ;;  %v3713_v31 = vpop.f32.mrb[46].mxu0 }
 0x2af   : > { %v2281_v23 = vpop.f32.mrb[19].mxu1  ;;  %v3715_v56 = vpop.f32.mrb[47].mxu0 }
 0x2b0   : > { %v3717_v30 = vadd.f32 %v2279_v4, %v1423_v29  ;;  %v2282_v53 = vadd.f32 %v2281_v23, %v2280_v9 }
 0x2b2   : > { %v3719_v34 = vadd.f32 %v2282_v53, %v1426_v49 }
 0x2b4   : > { %v2283_v38 = vpop.f32.mrb[20].mxu1 }
 0x2b5   : > { %v2284_v39 = vpop.f32.mrb[21].mxu1 }
 0x2b6   : > { %v2285_v45 = vadd.f32 %v2284_v39, %v2283_v38  ;;  %v2286_v25 = vpop.f32.mrb[22].mxu1 }
 0x2b7   : > { %v2287_v0 = vpop.f32.mrb[23].mxu1 }
 0x2b8   : > { %v3721_v62 = vadd.f32 %v2425_v2, %v2285_v45  ;;  %v2288_v6 = vadd.f32 %v2287_v0, %v2286_v25 }
 0x2ba   : > { %v3723_v7 = vadd.f32 %v2426_v46, %v2288_v6 }
 0x2bc   : > { %v2289_v27 = vpop.f32.mrb[24].mxu1  ;;  %v1493_v35 = vadd.f32 %v3723_v7, %v3721_v62 }
 0x2bd   : > { %v2290_v21 = vpop.f32.mrb[25].mxu1 }
 0x2be   : > { %v2291_v32 = vadd.f32 %v2290_v21, %v2289_v27  ;;  %v2292_v37 = vpop.f32.mrb[26].mxu1 }
 0x2bf   : > { %v2293_v22 = vpop.f32.mrb[27].mxu1 }
 0x2c0   : > { %v3725_v42 = vadd.f32 %v2291_v32, %v1439_v59  ;;  %v2294_v52 = vadd.f32 %v2293_v22, %v2292_v37  ;;  %v1486_v59 = vadd.f32 %v3719_v34, %v3717_v30 }
 0x2c2   : > { %v3727_v1 = vadd.f32 %v2294_v52, %v1442_v13  ;;  %v1487_v24 = vrot.slane %v1486_v59, 4 }
 0x2c4   : > { %v2295_v10 = vpop.f32.mrb[28].mxu1  ;;  %v1500_v55 = vadd.f32 %v3727_v1, %v3725_v42  ;;  %v1488_v0 = vadd.f32 %v1487_v24, %v1486_v59 }
 0x2c5   : > { %v2296_v12 = vpop.f32.mrb[29].mxu1 }
 0x2c6   : > { %v2297_v16 = vadd.f32 %v2296_v12, %v2295_v10  ;;  %v2298_v3 = vpop.f32.mrb[30].mxu1 }
 0x2c7   : > { %v2299_v26 = vpop.f32.mrb[31].mxu1 }
 0x2c8   : > { %v3729_v44 = vadd.f32 %v2429_v5, %v2297_v16  ;;  %v2300_v58 = vadd.f32 %v2299_v26, %v2298_v3  ;;  %v1489_v16 = vrot.slane %v1488_v0, 2 }
 0x2ca   : > { %v3731_v2 = vadd.f32 %v2430_v63, %v2300_v58  ;;  %v1494_v63 = vrot.slane %v1493_v35, 4 }
 0x2cc   : > { %v2301_v28 = vpop.f32.mrb[32].mxu1  ;;  %v1507_v8 = vadd.f32 %v3731_v2, %v3729_v44  ;;  %v1495_v23 = vadd.f32 %v1494_v63, %v1493_v35 }
 0x2cd   : > { %v2302_v29 = vpop.f32.mrb[33].mxu1 }
 0x2ce   : > { %v2303_v41 = vadd.f32 %v2302_v29, %v2301_v28  ;;  %v2304_v43 = vpop.f32.mrb[34].mxu1  ;;  %v1508_v51 = vrot.slane %v1507_v8, 4  ;;  %v1496_v21 = vrot.slane %v1495_v23, 2 }
 0x2cf   : > { %v2305_v46 = vpop.f32.mrb[35].mxu1 }
 0x2d0   : > { %v3733_v49 = vadd.f32 %v2303_v41, %v1455_v18  ;;  %v2306_v50 = vadd.f32 %v2305_v46, %v2304_v43  ;;  %v1501_v18 = vrot.slane %v1500_v55, 4  ;;  %v1509_v6 = vadd.f32 %v1508_v51, %v1507_v8 }
 0x2d1   : > { %v1497_v28 = vadd.f32 %v1496_v21, %v1495_v23 }
 0x2d2   : > { %v3735_v54 = vadd.f32 %v2306_v50, %v1458_v19  ;;  %v1502_v25 = vadd.f32 %v1501_v18, %v1500_v55  ;;  %v1510_v3 = vrot.slane %v1509_v6, 2 }
 0x2d4   : > { %v2307_v60 = vpop.f32.mrb[36].mxu1  ;;  %v1514_v13 = vadd.f32 %v3735_v54, %v3733_v49  ;;  %v1503_v10 = vrot.slane %v1502_v25, 2 }
 0x2d5   : > { %v2308_v40 = vpop.f32.mrb[37].mxu1 }
 0x2d6   : > { %v2309_v48 = vadd.f32 %v2308_v40, %v2307_v60  ;;  %v2310_v33 = vpop.f32.mrb[38].mxu1  ;;  %v1515_v53 = vrot.slane %v1514_v13, 4  ;;  %v1504_v60 = vadd.f32 %v1503_v10, %v1502_v25  ;;  %v1490_v40 = vadd.f32 %v1489_v16, %v1488_v0 }
 0x2d7   : > { %v2311_v61 = vpop.f32.mrb[39].mxu1 }
 0x2d8   : > { %v3739_v36 = vadd.f32 %v2433_v15, %v2309_v48  ;;  %v2312_v5 = vadd.f32 %v2311_v61, %v2310_v33  ;;  %v1516_v32 = vadd.f32 %v1515_v53, %v1514_v13  ;;  %v1511_v48 = vadd.f32 %v1510_v3, %v1509_v6 }
 0x2d9   : > { %v1505_v8 = vrot.slane %v1504_v60, 1  ;;  %v1491_v13 = vrot.slane %v1490_v40, 1 }
 0x2da   : > { %v3747_v11 = vadd.f32 %v2434_v20, %v2312_v5  ;;  %v1517_v29 = vrot.slane %v1516_v32, 2  ;;  %v1498_v5 = vrot.slane %v1497_v28, 1 }
 0x2db   : > { %v1506_v51 = vadd.f32 %v1505_v8, %v1504_v60 }
 0x2dc   : > { %v1521_v14 = vadd.f32 %v3747_v11, %v3739_v36  ;;  %v2313_v15 = vpop.f32.mrb[40].mxu1  ;;  %v1518_v61 = vadd.f32 %v1517_v29, %v1516_v32  ;;  %v1499_v18 = vadd.f32 %v1498_v5, %v1497_v28 }
 0x2dd   : > { %v2314_v19 = vpop.f32.mrb[41].mxu1 }
 0x2de   : > { %v2315_v4 = vadd.f32 %v2314_v19, %v2313_v15  ;;  %v2316_v9 = vpop.f32.mrb[42].mxu1  ;;  %v1522_v39 = vrot.slane %v1521_v14, 4  ;;  %v1519_v15 = vrot.slane %v1518_v61, 1 }
 0x2df   : > { %v2317_v38 = vpop.f32.mrb[43].mxu1 }
 0x2e0   : > { %v3754_v20 = vadd.f32 %v2315_v4, %v3711_v57  ;;  %v2318_v45 = vadd.f32 %v2317_v38, %v2316_v9  ;;  %v1523_v37 = vadd.f32 %v1522_v39, %v1521_v14  ;;  %v1512_v14 = vrot.slane %v1511_v48, 1 }
 0x2e1   : > { %v1520_v53 = vadd.f32 %v1519_v15, %v1518_v61 }
 0x2e2   : > { %v3757_v27 = vadd.f32 %v2318_v45, %v3715_v56  ;;  %v1524_v43 = vrot.slane %v1523_v37, 2  ;;  %v1513_v9 = vadd.f32 %v1512_v14, %v1511_v48 }
 0x2e4   : > { %v1528_v22 = vadd.f32 %v3757_v27, %v3754_v20  ;;  %v2319_v52 = vpop.f32.mrb[44].mxu1  ;;  %v1525_v55 = vadd.f32 %v1524_v43, %v1523_v37 }
 0x2e5   : > { %v2320_v12 = vpop.f32.mrb[45].mxu1 }
 0x2e6   : > { %v1529_v57 = vrot.slane %v1528_v22, 4  ;;  %v2321_v26 = vadd.f32 %v2320_v12, %v2319_v52  ;;  %v2322_v58 = vpop.f32.mrb[46].mxu1  ;;  %v1526_v19 = vrot.slane %v1525_v55, 1 }
 0x2e7   : > { %v2323_v41 = vpop.f32.mrb[47].mxu1 }
 0x2e8   : > { %v1530_v56 = vadd.f32 %v1529_v57, %v1528_v22  ;;  %v3762_v46 = vadd.f32 %v3709_v47, %v2321_v26  ;;  %v2324_v50 = vadd.f32 %v2323_v41, %v2322_v58  ;;  %v1527_v39 = vadd.f32 %v1526_v19, %v1525_v55 }
 0x2e9   : > { %v2954_v41 = vmov 1966171168  }
 0x2ea   : > { %v1531_v33 = vrot.slane %v1530_v56, 2  ;;  %v3765_v35 = vadd.f32 %v3713_v31, %v2324_v50  ;;  %v1492_v31 = vadd.f32 %v1491_v13, %v1490_v40  ;;  %v1747_v43 = vunpack.c.l.s4 %v2954_v41 }
 0x2ec   : > { %v1535_v59 = vadd.f32 %v3765_v35, %v3762_v46  ;;  %v1532_v63 = vadd.f32 %v1531_v33, %v1530_v56  ;;  %v1567_v38 = vsel %vm1566_vm1, %v1499_v18, %v1492_v31  ;;  %v1748_v56 = vunpack.c.0.s8 %v1747_v43  ;;  %v2718_v43 = vld [vmem:[%s3224_s7 + $0x58] sm:$0xff] }
 0x2ed   : > { %v1569_v25 = vsel %vm1568_vm5, %v1506_v51, %v1567_v38  ;;  %v1796_v33 = vsub.s32 0, %v3238_v17 }
 0x2ee   : > { %v1536_v47 = vrot.slane %v1535_v59, 4  ;;  %v1533_v4 = vrot.slane %v1532_v63, 1  ;;  %v1571_v21 = vsel %vm1570_vm6, %v1513_v9, %v1569_v25  ;;  %v1751_v50 = vsub.s32 %v1748_v56, %v3238_v17 }
 0x2ef   : > { %v1573_v32 = vsel %vm1572_vm11, %v1520_v53, %v1571_v21 }
 0x2f0   : > { %v1537_v24 = vadd.f32 %v1536_v47, %v1535_v59  ;;  %v1534_v0 = vadd.f32 %v1533_v4, %v1532_v63  ;;  %v1575_v22 = vsel %vm1574_vm12, %v1527_v39, %v1573_v32  ;;  %v2707_v32 = vld [vmem:[%s3224_s7] sm:$0xff] }
 0x2f2   : > { %v1538_v23 = vrot.slane %v1537_v24, 2  ;;  %v1577_v52 = vsel %vm1576_vm13, %v1534_v0, %v1575_v22  ;;  %v2712_v22 = vld [vmem:[%s3224_s7 + $0x28] sm:$0xff] }
 0x2f4   : > { %v1539_v45 = vadd.f32 %v1538_v23, %v1537_v24 }
 0x2f6   : > { %v1540_v6 = vrot.slane %v1539_v45, 1 }
 0x2f8   : > { %v1541_v37 = vadd.f32 %v1540_v6, %v1539_v45 }
 0x2fa   : > { %v1579_v10 = vsel %vm1578_vm14, %v1541_v37, %v1577_v52 }
 0x2fb   : > { %2472 = vmatmul.mubr.f32.vlgmr.msra.gmra.mrb[48].mxu0 %v1579_v10  ;;  %v2713_v10 = vld [vmem:[%s3224_s7 + $0x30] sm:$0xff] }
 0x3ce   : > { %v1647_v12 = vpop.f32.mrb[48].mxu0 }
 0x3cf   : > { %v1651_v16 = vmax.f32 %v1647_v12, 0.0  ;;  %v2473_v3 = vpop.f32.mrb[49].mxu0 }
 0x3d1   : > { %2507 = vmatmul.mubr.f32.vlgmr.msra.gmra.mrb[48].mxu1 %v1651_v16  ;;  %v2714_v16 = vld [vmem:[%s3224_s7 + $0x38] sm:$0xff] }
 0x4a4   : > { %v1734_v57 = vpop.f32.mrb[48].mxu1 }
 0x4a5   : > { %v2074_v26 = vmul.f32 -1.442695, %v1734_v57  ;;  %v2508_v58 = vpop.f32.mrb[49].mxu1  ;;  %v2715_v57 = vld [vmem:[%s3224_s7 + $0x40] sm:$0xff] }
 0x4a6   : > { %v2716_v58 = vld [vmem:[%s3224_s7 + $0x48] sm:$0xff] }
 0x4a7   : > { %2703 = vpow2.f32 %v2074_v26 }
 0x4b1   : > { %v2704_v28 = vpop.eup %2703 }
 0x4b2   : > { %v1741_v29 = vadd.f32 1.0, %v2704_v28 }
 0x4b4   : > { %2705 = vrcp.f32 %v1741_v29  ;;  %v2717_v29 = vld [vmem:[%s3224_s7 + $0x50] sm:$0xff] }
 0x4be   : > { %v2706_v60 = vpop.eup %2705 }
 0x4bf   : > { %v1745_v40 = vcombine.high %v2706_v60, %v2706_v60  ;;  %v1752_v48 = vrot.slane %v2706_v60, %v1751_v50 }
 0x4c1   : > { %v1759_v61 = vrot.slane %v1745_v40, %v1751_v50  ;;  %v1760_v5 = vcombine.high %v1752_v48, %v1752_v48  ;;  %v1768_v55 = vrot.slane %v1752_v48, %v1751_v50  ;;  %v2720_v40 = vld [vmem:[%s3224_s7 + $0x68] sm:$0xff] }
 0x4c3   : > { %v1761_v59 = vcombine.high %v1759_v61, %v1759_v61  ;;  %v1775_v8 = vrot.slane %v1759_v61, %v1751_v50  ;;  %v1782_v63 = vrot.slane %v1760_v5, %v1751_v50  ;;  %v1790_v13 = vcombine.high %v1768_v55, %v1768_v55  ;;  %v2722_v5 = vld [vmem:[%s3224_s7 + $0x78] sm:$0xff] }
 0x4c4   : > { %v1797_v14 = vrot.slane %v1768_v55, %v1796_v33 }
 0x4c5   : > { %v1789_v47 = vrot.slane %v1761_v59, %v1751_v50  ;;  %v1791_v15 = vcombine.high %v1775_v8, %v1775_v8  ;;  %v1792_v18 = vcombine.high %v1782_v63, %v1782_v63  ;;  %v1801_v19 = vrot.slane %v1782_v63, %v1796_v33  ;;  %v2719_v50 = vld [vmem:[%s3224_s7 + $0x60] sm:$0xff] }
 0x4c6   : > { %v1805_v24 = vrot.slane %v1790_v13, %v1796_v33  ;;  %v1813_v51 = vrot.slane %v1775_v8, %v1796_v33  ;;  %v1834_v4 = vmul.f32 %v1797_v14, %v3717_v30  ;;  %v1835_v31 = vmul.f32 %v1797_v14, %v3719_v34 }
 0x4c7   : > { %v1793_v9 = vcombine.high %v1789_v47, %v1789_v47  ;;  %v1809_v17 = vrot.slane %v1792_v18, %v1796_v33  ;;  %v1817_v23 = vrot.slane %v1789_v47, %v1796_v33  ;;  %v1821_v53 = vrot.slane %v1791_v15, %v1796_v33 }
 0x4c8   : > { %v1836_v38 = vmul.f32 %v1801_v19, %v3721_v62  ;;  %v1837_v39 = vmul.f32 %v1801_v19, %v3723_v7  ;;  %v1838_v45 = vmul.f32 %v1805_v24, %v3725_v42  ;;  %v1839_v25 = vmul.f32 %v1805_v24, %v3727_v1 }
 0x4c9   : > { %v1825_v0 = vrot.slane %v1793_v9, %v1796_v33  ;;  %v1840_v30 = vmul.f32 %v1809_v17, %v3729_v44  ;;  %v1841_v34 = vmul.f32 %v1809_v17, %v3731_v2  ;;  %v1842_v6 = vmul.f32 %v1813_v51, %v3733_v49  ;;  %v2721_v33 = vld [vmem:[%s3224_s7 + $0x70] sm:$0xff] }
 0x4ca   : > { %v1843_v21 = vmul.f32 %v1813_v51, %v3735_v54  ;;  %v1844_v62 = vmul.f32 %v1817_v23, %v3739_v36  ;;  %v1845_v7 = vmul.f32 %v1817_v23, %v3747_v11  ;;  %v1846_v42 = vmul.f32 %v1821_v53, %v3754_v20  ;;  %v2708_v54 = vld [vmem:[%s3224_s7 + $0x8] sm:$0xff]  ;;  %v2709_v11 = vld [vmem:[%s3224_s7 + $0x10] sm:$0xff] }
 0x4cb   : > { %v1847_v1 = vmul.f32 %v1821_v53, %v3757_v27  ;;  %v1848_v44 = vmul.f32 %v1825_v0, %v3762_v46  ;;  %v1849_v2 = vmul.f32 %v1825_v0, %v3765_v35  ;;  %v1850_v49 = vadd.f32 %v2707_v32, %v1834_v4  ;;  %v2710_v27 = vld [vmem:[%s3224_s7 + $0x18] sm:$0xff]  ;;  %v2711_v35 = vld [vmem:[%s3224_s7 + $0x20] sm:$0xff] }
 0x4cc   : > { %v1851_v36 = vadd.f32 %v2708_v54, %v1835_v31  ;;  %v1852_v20 = vadd.f32 %v2709_v11, %v1836_v38  ;;  %v1853_v46 = vadd.f32 %v2710_v27, %v1837_v39  ;;  %v1854_v37 = vadd.f32 %v2711_v35, %v1838_v45 }
 0x4cd   : > { %v1855_v52 = vadd.f32 %v2712_v22, %v1839_v25  ;;  %v1856_v12 = vadd.f32 %v2713_v10, %v1840_v30  ;;  %v1857_v3 = vadd.f32 %v2714_v16, %v1841_v34  ;;  %v1858_v26 = vadd.f32 %v2715_v57, %v1842_v6  ;;  %1866 = vst [vmem:[%s3791_s26] sm:$0xff] %v1850_v49 }
 0x4ce   : > { %v1859_v28 = vadd.f32 %v2716_v58, %v1843_v21  ;;  %v1860_v41 = vadd.f32 %v2717_v29, %v1844_v62  ;;  %v1861_v56 = vadd.f32 %v2718_v43, %v1845_v7  ;;  %v1862_v60 = vadd.f32 %v2719_v50, %v1846_v42  ;;  %1867 = vst [vmem:[%s3791_s26 + $0x8] sm:$0xff] %v1851_v36 }
 0x4cf   : > { %1868 = vst [vmem:[%s3791_s26 + $0x10] sm:$0xff] %v1852_v20  ;;  %1869 = vst [vmem:[%s3791_s26 + $0x18] sm:$0xff] %v1853_v46  ;;  %v1863_v48 = vadd.f32 %v2720_v40, %v1847_v1  ;;  %v1864_v61 = vadd.f32 %v2721_v33, %v1848_v44  ;;  %v1865_v55 = vadd.f32 %v2722_v5, %v1849_v2 }
 0x4d0   : > { %1870 = vst [vmem:[%s3791_s26 + $0x20] sm:$0xff] %v1854_v37  ;;  %1871 = vst [vmem:[%s3791_s26 + $0x28] sm:$0xff] %v1855_v52 }
 0x4d1   : > { %1872 = vst [vmem:[%s3791_s26 + $0x30] sm:$0xff] %v1856_v12  ;;  %1873 = vst [vmem:[%s3791_s26 + $0x38] sm:$0xff] %v1857_v3 }
 0x4d2   : > { %1874 = vst [vmem:[%s3791_s26 + $0x40] sm:$0xff] %v1858_v26  ;;  %1875 = vst [vmem:[%s3791_s26 + $0x48] sm:$0xff] %v1859_v28 }
 0x4d3   : > { %1876 = vst [vmem:[%s3791_s26 + $0x50] sm:$0xff] %v1860_v41  ;;  %1877 = vst [vmem:[%s3791_s26 + $0x58] sm:$0xff] %v1861_v56 }
 0x4d4   : > { %1878 = vst [vmem:[%s3791_s26 + $0x60] sm:$0xff] %v1862_v60  ;;  %1879 = vst [vmem:[%s3791_s26 + $0x68] sm:$0xff] %v1863_v48 }
 0x4d5   : > { %1880 = vst [vmem:[%s3791_s26 + $0x70] sm:$0xff] %v1864_v61  ;;  %1881 = vst [vmem:[%s3791_s26 + $0x78] sm:$0xff] %v1865_v55 }
 0x4d6   : > { %2878 = shalt.err (!%p2875_p13)
}
 0x4d7   : > { %s2879_s30 = scalar_lea.hbm %s3816_s17, 2048  ;;  %s2883_s28 = scalar_lea.hbm %s3883_s5, 4096 }
 0x4d8   : > { %p2880_p9 = scmp.ne.s32.totalorder %s3816_s17, %s2879_s30  ;;  %p2884_p6 = scmp.lt.u32.totalorder %s3816_s17, %s3883_s5 }
 0x4d9   : > { %p2885_p4 = scmp.lt.u32.totalorder %s2883_s28, %s2879_s30  ;;  %p2887_p10 = scmp.lt.u32.totalorder %s2879_s30, %s3816_s17 }
 0x4da   : > { %p2881_p0 = pnand %p2880_p9, %p3166_p3 }
 0x4db   : > { %p2886_p8 = por %p2885_p4, %p2884_p6 }
 0x4dc   : > { %p2882_p11 = pneg %p2881_p0 }
 0x4dd   : > { %p2888_p5 = por %p2887_p10, %p2886_p8 }
 0x4df   : > { %p2889_p7 = pnand %p2888_p5, %p2882_p11 }
 0x4e1   : > { %2892 = shalt.err (!%p2889_p7)
}
 0x4e2   : > { %s2956_s26 = smov 128   ;;  %s2957_s15 = smov 8  }
 0x4e3   : > { %2575 = dma.vmem_to_hbm [thread:$0]  (%p3166_p3), %s3820_s14, 2048, %s3816_s17, %s1883_s22, %s2956_s26, %s2956_s26, %s2957_s15  }
 0x4e4 PF: > { %s1912_s6 = sand.u32 1, %s2927_s18   ;;  %p3907_p12 = scmp.ne.s32.totalorder %s3889_s25, 0 }
 0x4e5   : > { %p3908_p1 = scmp.ge.s32.totalorder %s2939_s21, 2  ;;  %s1913_s16 = scalar_lea.sflag [#allocation5], %s1912_s6 }
 0x4e7   : > { %p2595_p2 = pnand %p3908_p1, %p3907_p12 }
 0x4e9   : > { %2922 = dma.done.wait (!%p2595_p2), %s1913_s16, 2048  }
 0x4ea   : > { %2924 = vsyncadd (!%p2595_p2), %s1913_s16, 4294965248  ;;  %p20_p13 = scmp.ge.s32.totalorder %s3153_s29, 4   ;;  %s3909_s18 = smov %s2931_s19 }
 0x4eb   : > { %s3910_s19 = smov %s2935_s20  ;;  %s3911_s20 = smov %s3162_s8 }
 0x4ec   : > { %s3912_s21 = smov %s3153_s29  ;;  %22 = sbr.rel (!%p20_p13) target bundleno = 7 (0x7), region = 101 }
 0x4f3   :  { %1918 = vsyncpa [#allocation4], 1 }
 0x4f4   :  { %1920 = vsyncpa [#allocation4 + $0x1], 1 }
 0x4f5   :  { %1921 = vsyncpa [#allocation7], 1 }
 0x4f6   :  { %1922 = vsyncpa [#allocation10], 1 }
 0x4f7   :  { %1923 = vsyncpa [#allocation5], 1 }
 0x4f8   :  { %1925 = vsyncpa [#allocation5 + $0x1], 1 }

</bundles_post_ra>
